<compile_context>
chip_gen: v6e
topology: v6e:2x2x1
jax: 0.10.0
libtpu: 0.0.40
codegen_flags: <defaults>
</compile_context>

<pallas_src>
import jax
import jax.numpy as jnp
from jax.experimental import pallas as pl
from jax.experimental.pallas import tpu as pltpu


def _round_up(x, m):
    return (x + m - 1) // m * m


# ----------------------------------------------------------------------------
# Kernels
# ----------------------------------------------------------------------------
def _resident_kernel(x_ref, w1_ref, b1_ref, w2_ref, b2_ref, o_ref):
    # x_ref: (tb, D) f32 | w1_ref: (D, H) | b1_ref: (1, H) f32
    # w2_ref: (H, D)     | b2_ref: (1, D) f32 | o_ref: (tb, D)
    x = x_ref[...].astype(jnp.float32)
    cd = w1_ref.dtype                                   # matmul operand dtype (f32 or bf16)
    h = jnp.dot(x.astype(cd), w1_ref[...], preferred_element_type=jnp.float32)
    h = jnp.maximum(h + b1_ref[...], 0.0)               # bias + ReLU in f32 on the VPU
    y = jnp.dot(h.astype(cd), w2_ref[...], preferred_element_type=jnp.float32)
    o_ref[...] = (x + y + b2_ref[...]).astype(o_ref.dtype)   # residual add in f32


def _htiled_kernel(x_ref, w1_ref, b1_ref, w2_ref, b2_ref, o_ref, acc_ref):
    # Grid = (batch tiles, hidden tiles); hidden (reduction) axis last / 'arbitrary'.
    j = pl.program_id(1)
    x = x_ref[...].astype(jnp.float32)

    @pl.when(j == 0)
    def _():
        acc_ref[...] = x + b2_ref[...]                  # seed accumulator: residual + bias2

    cd = w1_ref.dtype
    h = jnp.dot(x.astype(cd), w1_ref[...], preferred_element_type=jnp.float32)
    h = jnp.maximum(h + b1_ref[...], 0.0)
    acc_ref[...] += jnp.dot(h.astype(cd), w2_ref[...], preferred_element_type=jnp.float32)

    @pl.when(j == pl.num_programs(1) - 1)
    def _():
        o_ref[...] = acc_ref[...].astype(o_ref.dtype)


# ----------------------------------------------------------------------------
# pallas_call builders
# ----------------------------------------------------------------------------
def _cost(Bp, D, H, w_bytes):
    return pl.CostEstimate(
        flops=4 * Bp * D * H,
        transcendentals=0,
        bytes_accessed=2 * Bp * D * 4 + 2 * D * H * w_bytes + (H + D) * 4,
    )


def _call_resident(x, w1, b1, w2, b2, tb, *, single_buffer_weights):
    Bp, D = x.shape
    H = w1.shape[1]
    w_bytes = jnp.dtype(w1.dtype).itemsize
    n_wbuf = 1 if single_buffer_weights else 2
    vmem_est = (2 * tb * D * 4) * 2 + n_wbuf * (2 * D * H * w_bytes + (H + D) * 4) + tb * H * 4
    vmem_limit = int(max(32 << 20, min(64 << 20, 4 * vmem_est)))
    const = dict(pipeline_mode=pl.Buffered(1)) if single_buffer_weights else {}

    return pl.pallas_call(
        _resident_kernel,
        out_shape=jax.ShapeDtypeStruct((Bp, D), x.dtype),
        grid_spec=pltpu.PrefetchScalarGridSpec(
            num_scalar_prefetch=0,
            grid=(Bp // tb,),
            in_specs=[
                pl.BlockSpec((tb, D), lambda i: (i, 0)),           # x tile (pipelined)
                pl.BlockSpec((D, H), lambda i: (0, 0), **const),   # W1 (VMEM resident)
                pl.BlockSpec((1, H), lambda i: (0, 0), **const),   # b1
                pl.BlockSpec((H, D), lambda i: (0, 0), **const),   # W2 (VMEM resident)
                pl.BlockSpec((1, D), lambda i: (0, 0), **const),   # b2
            ],
            out_specs=pl.BlockSpec((tb, D), lambda i: (i, 0)),
        ),
        compiler_params=pltpu.CompilerParams(
            dimension_semantics=("parallel",),
            vmem_limit_bytes=vmem_limit),
        cost_estimate=_cost(Bp, D, H, w_bytes),
    )(x, w1, b1, w2, b2)


def _call_htiled(x, w1, b1, w2, b2, tb, th):
    Bp, D = x.shape
    H = w1.shape[1]
    w_bytes = jnp.dtype(w1.dtype).itemsize
    vmem_est = ((2 * tb * D * 4) * 2 + 2 * (2 * D * th * w_bytes + (th + D) * 4)
                + tb * D * 4 + tb * th * 4)
    vmem_limit = int(max(32 << 20, min(64 << 20, 4 * vmem_est)))

    return pl.pallas_call(
        _htiled_kernel,
        out_shape=jax.ShapeDtypeStruct((Bp, D), x.dtype),
        grid_spec=pltpu.PrefetchScalarGridSpec(
            num_scalar_prefetch=0,
            grid=(Bp // tb, H // th),                    # reduction (hidden) axis last
            in_specs=[
                pl.BlockSpec((tb, D), lambda i, j: (i, 0)),
                pl.BlockSpec((D, th), lambda i, j: (0, j)),
                pl.BlockSpec((1, th), lambda i, j: (0, j)),
                pl.BlockSpec((th, D), lambda i, j: (j, 0)),
                pl.BlockSpec((1, D), lambda i, j: (0, 0)),
            ],
            out_specs=pl.BlockSpec((tb, D), lambda i, j: (i, 0)),
            scratch_shapes=[pltpu.VMEM((tb, D), jnp.float32)],
        ),
        compiler_params=pltpu.CompilerParams(
            dimension_semantics=("parallel", "arbitrary"),
            vmem_limit_bytes=vmem_limit),
        cost_estimate=_cost(Bp, D, H, w_bytes),
    )(x, w1, b1, w2, b2)


# ----------------------------------------------------------------------------
# Public wrapper
# ----------------------------------------------------------------------------
def resnet_block(x, w1, b1, w2, b2, *, tb=256, th=512,
                 use_bf16_matmul=True, force_tiled=False,
                 resident_weight_budget_bytes=40 << 20):
    """x:(B,D), w1:(D,H), b1:(H,), w2:(H,D), b2:(D,)  ->  x + relu(x@W1+b1)@W2 + b2."""
    B, D = x.shape
    H = w1.shape[1]
    assert w1.shape == (D, H) and w2.shape == (H, D)
    assert D % 128 == 0 and H % 128 == 0, "feature dims must be lane-aligned (multiples of 128)"

    w_dtype = jnp.bfloat16 if use_bf16_matmul else jnp.float32
    w1c = w1.astype(w_dtype)
    w2c = w2.astype(w_dtype)
    b1c = jnp.asarray(b1, jnp.float32).reshape(1, H)
    b2c = jnp.asarray(b2, jnp.float32).reshape(1, D)
    x32 = x.astype(jnp.float32)

    # Batch tile: large (MXU fill + overhead amortization), multiple of 16 (bf16 packing).
    tb = max(16, min(tb, _round_up(B, 16)))
    Bp = _round_up(B, tb)
    if Bp != B:                                          # ragged batch -> pad, slice back later
        x32 = jnp.zeros((Bp, D), jnp.float32).at[:B].set(x32)

    w_bytes = jnp.dtype(w_dtype).itemsize
    resident_ok = (2 * D * H * w_bytes) <= resident_weight_budget_bytes

    if resident_ok and not force_tiled:
        try:   # prefer single-buffered weight blocks (index map is constant across the grid)
            out = _call_resident(x32, w1c, b1c, w2c, b2c, tb, single_buffer_weights=True)
        except Exception:
            out = _call_resident(x32, w1c, b1c, w2c, b2c, tb, single_buffer_weights=False)
    else:
        th_eff = min(th, H)
        while H % th_eff:                                # th must divide H, stay multiple of 128
            th_eff -= 128
        th_eff = max(128, th_eff)
        out = _call_htiled(x32, w1c, b1c, w2c, b2c, tb, th_eff)

    if Bp != B:
        out = out[:B]
    return out.astype(x.dtype)


def resnet_block_ref(x, w1, b1, w2, b2):
    h = jnp.maximum(x @ w1 + b1.reshape(1, -1), 0.0)
    return x + (h @ w2 + b2.reshape(1, -1))


# ----------------------------------------------------------------------------
if __name__ == "__main__":
    # Shapes consistent with ResNetBlock(input_dim, hidden_dim) applied to a 2-D batch.
    batch, input_dim, hidden_dim = 1024, 128, 256

    key = jax.random.PRNGKey(0)
    kx, kw1, kb1, kw2, kb2 = jax.random.split(key, 5)

    x = jax.random.normal(kx, (batch, input_dim), dtype=jnp.float32)
    lim1 = 1.0 / jnp.sqrt(input_dim)
    lim2 = 1.0 / jnp.sqrt(hidden_dim)
    # PyTorch nn.Linear stores (out,in); here weights are pre-transposed: W1 (in,hid), W2 (hid,in).
    w1 = jax.random.uniform(kw1, (input_dim, hidden_dim), jnp.float32, -lim1, lim1)
    b1 = jax.random.uniform(kb1, (hidden_dim,), jnp.float32, -lim1, lim1)
    w2 = jax.random.uniform(kw2, (hidden_dim, input_dim), jnp.float32, -lim2, lim2)
    b2 = jax.random.uniform(kb2, (input_dim,), jnp.float32, -lim2, lim2)

    ref = resnet_block_ref(x, w1, b1, w2, b2)

    # 1) f32 matmul path (faithful to the PyTorch f32 module).
    out_f32 = jax.block_until_ready(resnet_block(x, w1, b1, w2, b2, use_bf16_matmul=False))
    assert out_f32.shape == (batch, input_dim)
    assert jnp.allclose(out_f32, ref, atol=1e-5, rtol=1e-5), "f32 path mismatch"

    # 2) bf16-operand matmul path (v6e/v7x fast path; f32 accumulation + f32 elementwise).
    out_bf16 = jax.block_until_ready(resnet_block(x, w1, b1, w2, b2, use_bf16_matmul=True))
    assert jnp.allclose(out_bf16, ref, atol=1e-1, rtol=5e-2), "bf16 path mismatch"

    # 3) H-tiled accumulator path (fallback for hidden sizes whose weights exceed VMEM).
    out_tiled = jax.block_until_ready(
        resnet_block(x, w1, b1, w2, b2, use_bf16_matmul=False, force_tiled=True, th=128))
    assert jnp.allclose(out_tiled, ref, atol=1e-5, rtol=1e-5), "tiled path mismatch"

    # 4) ragged batch (wrapper pads to the batch tile and slices back).
    out_rag = jax.block_until_ready(
        resnet_block(x[:300], w1, b1, w2, b2, use_bf16_matmul=False))
    assert jnp.allclose(out_rag, ref[:300], atol=1e-5, rtol=1e-5), "ragged path mismatch"

    print("KERNEL_OK")
</pallas_src>

<mosaic_0001>
module attributes {stable_mosaic.version = 11 : i64} {
  func.func @_resident_kernel(%arg0: i32, %arg1: memref<256x128xf32, #tpu.memory_space<vmem>>, %arg2: memref<128x256xf32, #tpu.memory_space<vmem>>, %arg3: memref<1x256xf32, #tpu.memory_space<vmem>>, %arg4: memref<256x128xf32, #tpu.memory_space<vmem>>, %arg5: memref<1x128xf32, #tpu.memory_space<vmem>>, %arg6: memref<256x128xf32, #tpu.memory_space<vmem>>) attributes {dimension_semantics = [#tpu.dimension_semantics<parallel>], iteration_bounds = array<i64: 4>, scalar_prefetch = 0 : i64, scratch_operands = 0 : i64, tpu.core_type = #tpu.core_type<tc>, window_params = [{transform_indices = @transform_0, window_bounds = array<i64: 256, 128>}, {pipeline_mode = #tpu.pipeline_mode<synchronous>, transform_indices = @transform_1, window_bounds = array<i64: 128, 256>}, {pipeline_mode = #tpu.pipeline_mode<synchronous>, transform_indices = @transform_2, window_bounds = array<i64: 1, 256>}, {pipeline_mode = #tpu.pipeline_mode<synchronous>, transform_indices = @transform_3, window_bounds = array<i64: 256, 128>}, {pipeline_mode = #tpu.pipeline_mode<synchronous>, transform_indices = @transform_4, window_bounds = array<i64: 1, 128>}, {transform_indices = @transform_5, window_bounds = array<i64: 256, 128>}]} {
    %c0 = arith.constant 0 : index
    %c0_0 = arith.constant 0 : index
    %0 = vector.load %arg1[%c0, %c0_0] : memref<256x128xf32, #tpu.memory_space<vmem>>, vector<256x128xf32>
    %c0_1 = arith.constant 0 : index
    %c0_2 = arith.constant 0 : index
    %1 = vector.load %arg2[%c0_1, %c0_2] : memref<128x256xf32, #tpu.memory_space<vmem>>, vector<128x256xf32>
    %cst = arith.constant dense<0.000000e+00> : vector<256x256xf32>
    %2 = tpu.matmul %0, %1, %cst {dimension_numbers = #tpu.dot_dimension_numbers<[1], [0], [0], [1], [0, 0, 1, 1], [], []>} : vector<256x128xf32>, vector<128x256xf32>, vector<256x256xf32> -> vector<256x256xf32>
    %c0_3 = arith.constant 0 : index
    %c0_4 = arith.constant 0 : index
    %3 = vector.load %arg3[%c0_3, %c0_4] : memref<1x256xf32, #tpu.memory_space<vmem>>, vector<1x256xf32>
    %4 = vector.broadcast %3 : vector<1x256xf32> to vector<256x256xf32>
    %5 = arith.addf %2, %4 : vector<256x256xf32>
    %cst_5 = arith.constant 0.000000e+00 : f32
    %6 = vector.broadcast %cst_5 : f32 to vector<256x256xf32>
    %7 = arith.maximumf %5, %6 : vector<256x256xf32>
    %c0_6 = arith.constant 0 : index
    %c0_7 = arith.constant 0 : index
    %8 = vector.load %arg4[%c0_6, %c0_7] : memref<256x128xf32, #tpu.memory_space<vmem>>, vector<256x128xf32>
    %cst_8 = arith.constant dense<0.000000e+00> : vector<256x128xf32>
    %9 = tpu.matmul %7, %8, %cst_8 {dimension_numbers = #tpu.dot_dimension_numbers<[1], [0], [0], [1], [0, 0, 1, 1], [], []>} : vector<256x256xf32>, vector<256x128xf32>, vector<256x128xf32> -> vector<256x128xf32>
    %10 = arith.addf %0, %9 : vector<256x128xf32>
    %c0_9 = arith.constant 0 : index
    %c0_10 = arith.constant 0 : index
    %11 = vector.load %arg5[%c0_9, %c0_10] : memref<1x128xf32, #tpu.memory_space<vmem>>, vector<1x128xf32>
    %12 = vector.broadcast %11 : vector<1x128xf32> to vector<256x128xf32>
    %13 = arith.addf %10, %12 : vector<256x128xf32>
    %c0_11 = arith.constant 0 : index
    %c0_12 = arith.constant 0 : index
    %14 = vector.load %arg6[%c0_11, %c0_12] : memref<256x128xf32, #tpu.memory_space<vmem>>, vector<256x128xf32>
    tpu.vector_store %arg6[%c0_11, %c0_12], %13 {strides = array<i32>} : memref<256x128xf32, #tpu.memory_space<vmem>>, vector<256x128xf32>,
    return
  }
  func.func @transform_0(%arg0: i32) -> (i32, i32) {
    %c0_i32 = arith.constant 0 : i32
    %c0_i32_0 = arith.constant 0 : i32
    return %arg0, %c0_i32 : i32, i32
  }
  func.func @transform_1(%arg0: i32) -> (i32, i32) {
    %c0_i32 = arith.constant 0 : i32
    %c0_i32_0 = arith.constant 0 : i32
    %c0_i32_1 = arith.constant 0 : i32
    return %c0_i32, %c0_i32_0 : i32, i32
  }
  func.func @transform_2(%arg0: i32) -> (i32, i32) {
    %c0_i32 = arith.constant 0 : i32
    %c0_i32_0 = arith.constant 0 : i32
    %c0_i32_1 = arith.constant 0 : i32
    return %c0_i32, %c0_i32_0 : i32, i32
  }
  func.func @transform_3(%arg0: i32) -> (i32, i32) {
    %c0_i32 = arith.constant 0 : i32
    %c0_i32_0 = arith.constant 0 : i32
    %c0_i32_1 = arith.constant 0 : i32
    return %c0_i32, %c0_i32_0 : i32, i32
  }
  func.func @transform_4(%arg0: i32) -> (i32, i32) {
    %c0_i32 = arith.constant 0 : i32
    %c0_i32_0 = arith.constant 0 : i32
    %c0_i32_1 = arith.constant 0 : i32
    return %c0_i32, %c0_i32_0 : i32, i32
  }
  func.func @transform_5(%arg0: i32) -> (i32, i32) {
    %c0_i32 = arith.constant 0 : i32
    %c0_i32_0 = arith.constant 0 : i32
    return %arg0, %c0_i32 : i32, i32
  }
}

module attributes {stable_mosaic.version = 11 : i64} {
  func.func @_resident_kernel(%arg0: i32, %arg1: memref<256x128xf32, #tpu.memory_space<vmem>>, %arg2: memref<128x256xf32, #tpu.memory_space<vmem>>, %arg3: memref<1x256xf32, #tpu.memory_space<vmem>>, %arg4: memref<256x128xf32, #tpu.memory_space<vmem>>, %arg5: memref<1x128xf32, #tpu.memory_space<vmem>>, %arg6: memref<256x128xf32, #tpu.memory_space<vmem>>) attributes {dimension_semantics = [#tpu.dimension_semantics<parallel>], iteration_bounds = array<i64: 4>, scalar_prefetch = 0 : i64, scratch_operands = 0 : i64, tpu.core_type = #tpu.core_type<tc>, window_params = [{transform_indices = @transform_0, window_bounds = array<i64: 256, 128>}, {pipeline_mode = #tpu.pipeline_mode<synchronous>, transform_indices = @transform_1, window_bounds = array<i64: 128, 256>}, {pipeline_mode = #tpu.pipeline_mode<synchronous>, transform_indices = @transform_2, window_bounds = array<i64: 1, 256>}, {pipeline_mode = #tpu.pipeline_mode<synchronous>, transform_indices = @transform_3, window_bounds = array<i64: 256, 128>}, {pipeline_mode = #tpu.pipeline_mode<synchronous>, transform_indices = @transform_4, window_bounds = array<i64: 1, 128>}, {transform_indices = @transform_5, window_bounds = array<i64: 256, 128>}]} {
    %c0 = arith.constant 0 : index
    %c0_0 = arith.constant 0 : index
    %0 = vector.load %arg1[%c0, %c0_0] : memref<256x128xf32, #tpu.memory_space<vmem>>, vector<256x128xf32>
    %c0_1 = arith.constant 0 : index
    %c0_2 = arith.constant 0 : index
    %1 = vector.load %arg2[%c0_1, %c0_2] : memref<128x256xf32, #tpu.memory_space<vmem>>, vector<128x256xf32>
    %cst = arith.constant dense<0.000000e+00> : vector<256x256xf32>
    %2 = tpu.matmul %0, %1, %cst {dimension_numbers = #tpu.dot_dimension_numbers<[1], [0], [0], [1], [0, 0, 1, 1], [], []>} : vector<256x128xf32>, vector<128x256xf32>, vector<256x256xf32> -> vector<256x256xf32>
    %c0_3 = arith.constant 0 : index
    %c0_4 = arith.constant 0 : index
    %3 = vector.load %arg3[%c0_3, %c0_4] : memref<1x256xf32, #tpu.memory_space<vmem>>, vector<1x256xf32>
    %4 = vector.broadcast %3 : vector<1x256xf32> to vector<256x256xf32>
    %5 = arith.addf %2, %4 : vector<256x256xf32>
    %cst_5 = arith.constant 0.000000e+00 : f32
    %6 = vector.broadcast %cst_5 : f32 to vector<256x256xf32>
    %7 = arith.maximumf %5, %6 : vector<256x256xf32>
    %c0_6 = arith.constant 0 : index
    %c0_7 = arith.constant 0 : index
    %8 = vector.load %arg4[%c0_6, %c0_7] : memref<256x128xf32, #tpu.memory_space<vmem>>, vector<256x128xf32>
    %cst_8 = arith.constant dense<0.000000e+00> : vector<256x128xf32>
    %9 = tpu.matmul %7, %8, %cst_8 {dimension_numbers = #tpu.dot_dimension_numbers<[1], [0], [0], [1], [0, 0, 1, 1], [], []>} : vector<256x256xf32>, vector<256x128xf32>, vector<256x128xf32> -> vector<256x128xf32>
    %10 = arith.addf %0, %9 : vector<256x128xf32>
    %c0_9 = arith.constant 0 : index
    %c0_10 = arith.constant 0 : index
    %11 = vector.load %arg5[%c0_9, %c0_10] : memref<1x128xf32, #tpu.memory_space<vmem>>, vector<1x128xf32>
    %12 = vector.broadcast %11 : vector<1x128xf32> to vector<256x128xf32>
    %13 = arith.addf %10, %12 : vector<256x128xf32>
    %c0_11 = arith.constant 0 : index
    %c0_12 = arith.constant 0 : index
    %14 = vector.load %arg6[%c0_11, %c0_12] : memref<256x128xf32, #tpu.memory_space<vmem>>, vector<256x128xf32>
    tpu.vector_store %arg6[%c0_11, %c0_12], %13 {strides = array<i32>} : memref<256x128xf32, #tpu.memory_space<vmem>>, vector<256x128xf32>,
    return
  }
  func.func @transform_0(%arg0: i32) -> (i32, i32) {
    %c0_i32 = arith.constant 0 : i32
    %c0_i32_0 = arith.constant 0 : i32
    return %arg0, %c0_i32 : i32, i32
  }
  func.func @transform_1(%arg0: i32) -> (i32, i32) {
    %c0_i32 = arith.constant 0 : i32
    %c0_i32_0 = arith.constant 0 : i32
    %c0_i32_1 = arith.constant 0 : i32
    return %c0_i32, %c0_i32_0 : i32, i32
  }
  func.func @transform_2(%arg0: i32) -> (i32, i32) {
    %c0_i32 = arith.constant 0 : i32
    %c0_i32_0 = arith.constant 0 : i32
    %c0_i32_1 = arith.constant 0 : i32
    return %c0_i32, %c0_i32_0 : i32, i32
  }
  func.func @transform_3(%arg0: i32) -> (i32, i32) {
    %c0_i32 = arith.constant 0 : i32
    %c0_i32_0 = arith.constant 0 : i32
    %c0_i32_1 = arith.constant 0 : i32
    return %c0_i32, %c0_i32_0 : i32, i32
  }
  func.func @transform_4(%arg0: i32) -> (i32, i32) {
    %c0_i32 = arith.constant 0 : i32
    %c0_i32_0 = arith.constant 0 : i32
    %c0_i32_1 = arith.constant 0 : i32
    return %c0_i32, %c0_i32_0 : i32, i32
  }
  func.func @transform_5(%arg0: i32) -> (i32, i32) {
    %c0_i32 = arith.constant 0 : i32
    %c0_i32_0 = arith.constant 0 : i32
    return %arg0, %c0_i32 : i32, i32
  }
}

</mosaic_0001>

<bundles_post_ra>
// kernel: tpu_custom_call.1
= control target key start
LH: loop header
LB: loop body
LE: loop exit
PB: predicated region body
PF: predicated region fallthrough
CT: control target
= control target key end

     0   :  { %10 = vsyncpa [#allocation3], 0  ;;  %s2084_s0 = inlined_call_operand.hbm [shape: f32[1024,128], index: 0, kind: input, shape index: {}]   ;;  %s2085_s1 = inlined_call_operand.hbm [shape: f32[128,256], index: 1, kind: input, shape index: {}]   ;;  %s2086_s2 = inlined_call_operand.vmem [shape: f32[1,256], index: 2, kind: input, shape index: {}]   ;;  %s2087_s3 = inlined_call_operand.hbm [shape: f32[256,128], index: 3, kind: input, shape index: {}]   ;;  %s2088_s4 = inlined_call_operand.vmem [shape: f32[1,128], index: 4, kind: input, shape index: {}]   ;;  %s2089_s5 = inlined_call_operand.hbm [shape: f32[1024,128], index: 5, kind: output, shape index: {}]  }
   0x1   :  { %12 = vsyncpa [#allocation3 + $0x1], 0 }
   0x2   :  { %13 = vsyncpa [#allocation6], 0 }
   0x3   :  { %14 = vsyncpa [#allocation4], 0 }
   0x4   :  { %16 = vsyncpa [#allocation4 + $0x1], 0  ;;  %s1489_s18 = smov 0   ;;  %s1491_s19 = smov 0  }
   0x5   :  { %s1493_s20 = smov 0   ;;  %s1495_s21 = smov 0  }
   0x6 LB: > { %s1510_s22 = sadd.s32 4294967295, %s1446_s21   ;;  %s1137_s23 = sadd.s32 4294967294, %s1446_s21   ;;  %s1446_s21 = sphi %s1495_s21, %s2112_s21   ;;  %s1442_s20 = sphi %s1493_s20, %s2111_s20   ;;  %s1438_s19 = sphi %s1491_s19, %s2110_s19   ;;  %s1434_s18 = sphi %s1489_s18, %s2109_s18  }
   0x7   : > { %p42_p0 = scmp.ne.s32.totalorder %s1438_s19, %s1434_s18  ;;  %p2090_p1 = scmp.eq.s32.totalorder %s1510_s22, 0 }
   0x8   : > { %p156_p3 = scmp.eq.s32.totalorder %s1137_s23, 3  ;;  %p1138_p5 = scmp.ge.s32.totalorder %s1446_s21, 1 }
   0x9   : > { %p1519_p4 = por %p2090_p1, %p42_p0  ;;  %p163_p7 = scmp.lt.s32.totalorder %s1446_s21, 5 }
   0xa   : > { %p1524_p6 = por %p156_p3, %p42_p0  ;;  %s1448_s27 = smov [#allocation5]  }
   0xb   : > { %s2095_s24 = scalar_select %p1519_p4, 1, 0 }
   0xc   : > { %s2096_s25 = scalar_select %p1524_p6, 1, 0 }
   0xd   : > { %p1529_p8 = pnand %p1138_p5, %p163_p7  ;;  %s175_s28 = sshll.u32 %s1448_s27, 4  ;;  %s176_s28 = int_to_ptr.vmem [resolvable:$true] %s175_s28 }
   0xe   : > { %s1449_s30 = smov [#allocation7]   ;;  %s1309_s7 = scalar_lea.vmem %s176_s28, 4096 }
   0xf   : > { %s2097_s26 = scalar_select %p1529_p8, 1, 0 }
  0x10   : > { %p1234_p9 = pneg %p1529_p8  ;;  %s191_s6 = sshll.u32 %s1449_s30, 4  ;;  %s192_s6 = int_to_ptr.vmem [resolvable:$true] %s191_s6 }
  0x11   : > { %p1310_p12 = scmp.ne.s32.totalorder %s176_s28, %s1309_s7  ;;  %p1317_p3 = scmp.lt.s32.totalorder %s176_s28, %s176_s28 }
  0x12   : > { %p1537_p10 = pnand %p1234_p9, %p2090_p1  ;;  %p1318_p5 = scmp.lt.s32.totalorder %s1309_s7, %s1309_s7 }
  0x14   : > { %p1300_p11 = pneg %p1537_p10  ;;  %p1319_p7 = por %p1318_p5, %p1317_p3 }
  0x16   : > { %p1312_p13 = pnand %p1310_p12, %p1300_p11 }
  0x18   : > { %p1313_p0 = pneg %p1312_p13 }
  0x1a   : > { %p1320_p9 = pnand %p1319_p7, %p1313_p0 }
  0x1c   : > { %1323 = shalt.err (!%p1320_p9)
}
  0x1d   : > { %s1450_s8 = smov 256   ;;  %s1451_s9 = smov 16  }
  0x1e   : > { %1237 = dma.hbm_to_vmem [thread:$0]  (!%p1537_p10), %s2085_s1, 4096, %s176_s28, [#allocation6], %s1450_s8, %s1450_s8, %s1451_s9  }
  0x1f   : > { %s1335_s12 = scalar_lea.vmem %s192_s6, 4096  ;;  %p1343_p2 = scmp.lt.s32.totalorder %s192_s6, %s192_s6 }
  0x20   : > { %p1336_p1 = scmp.ne.s32.totalorder %s192_s6, %s1335_s12  ;;  %p1344_p6 = scmp.lt.s32.totalorder %s1335_s12, %s1335_s12 }
  0x22   : > { %p1338_p12 = pnand %p1336_p1, %p1300_p11  ;;  %p1345_p3 = por %p1344_p6, %p1343_p2 }
  0x24   : > { %p1339_p13 = pneg %p1338_p12 }
  0x26   : > { %p1346_p0 = pnand %p1345_p3, %p1339_p13 }
  0x28   : > { %1349 = shalt.err (!%p1346_p0)
}
  0x29   : > { %s2091_s13 = smov 128   ;;  %s1453_s14 = smov 8  }
  0x2a   : > { %1240 = dma.hbm_to_vmem [thread:$0]  (!%p1537_p10), %s2087_s3, 4096, %s192_s6, [#allocation6], %s2091_s13, %s2091_s13, %s1453_s14  }
  0x2b   : > { %s1563_s17 = sadd.s32 1, %s1446_s21   ;;  %s29_s27 = sadd.s32 1, %s1442_s20 }
  0x2c   : > { %s26_s23 = ssub.s32 %s1446_s21, %s1563_s17  ;;  %p36_p2 = scmp.ne.s32.totalorder %s1442_s20, %s1438_s19 }
  0x2d   : > { %p27_p1 = scmp.eq.s32.totalorder %s26_s23, 0  ;;  %p37_p6 = scmp.eq.s32.totalorder %s1446_s21, 0 }
  0x2e   : > { %p2099_p5 = scmp.eq.s32.totalorder %s1510_s22, 3  ;;  %p1251_p9 = scmp.lt.s32.totalorder %s1446_s21, 4 }
  0x2f   : > { %s1572_s28 = scalar_select %p27_p1, %s1442_s20, %s29_s27  }
  0x30   : > { %p38_p11 = por %p37_p6, %p36_p2  ;;  %p1576_p7 = por %p2099_p5, %p36_p2 }
  0x31   : > { %s208_s30 = sand.u32 1, %s1442_s20   ;;  %s1156_s6 = sshll.u32 %s1446_s21, 12 }
  0x32   : > { %s2100_s29 = scalar_select %p1576_p7, 1, 0 }
  0x33   : > { %s1142_s7 = sshll.u32 %s208_s30, 8  ;;  %s1586_s10 = scalar_lea.hbm %s2084_s0, %s1156_s6 }
  0x34   : > { %s212_s11 = scalar_lea.vmem [#allocation2], %s1142_s7  ;;  %p1590_p10 = pnand %p1251_p9, %p38_p11 }
  0x35   : > { %s219_s12 = sshll.u32 %s212_s11, 4  ;;  %s1594_s16 = scalar_lea.sflag [#allocation3], %s208_s30  ;;  %s1588_s12 = int_to_ptr.vmem [resolvable:$true] %s219_s12 }
  0x36   : > { %s1350_s23 = scalar_lea.hbm %s1586_s10, 4096  ;;  %p1352_p13 = pneg %p1590_p10 }
  0x37   : > { %p1351_p12 = scmp.ne.s32.totalorder %s1586_s10, %s1350_s23  ;;  %s1355_s7 = scalar_lea.hbm %s2084_s0, 16384 }
  0x38   : > { %p1356_p1 = scmp.lt.s32.totalorder %s1586_s10, %s2084_s0  ;;  %p1357_p2 = scmp.lt.s32.totalorder %s1355_s7, %s1350_s23 }
  0x39   : > { %p1353_p3 = pnand %p1352_p13, %p1351_p12 }
  0x3a   : > { %p1358_p6 = por %p1357_p2, %p1356_p1 }
  0x3b   : > { %p1354_p0 = pneg %p1353_p3 }
  0x3d   : > { %p1359_p11 = pnand %p1358_p6, %p1354_p0 }
  0x3f   : > { %1362 = shalt.err (!%p1359_p11)
}
  0x40   : > { %s1363_s30 = scalar_lea.vmem %s1588_s12, 4096  ;;  %s1454_s11 = smov [#allocation2]  }
  0x41   : > { %p1364_p5 = scmp.ne.s32.totalorder %s1588_s12, %s1363_s30  ;;  %s1368_s13 = sshll.u32 %s1454_s11, 4  ;;  %s1369_s13 = int_to_ptr.vmem [resolvable:$false] %s1368_s13 }
  0x42   : > { %s1370_s27 = scalar_lea.vmem %s1369_s13, 8192  ;;  %p1371_p3 = scmp.lt.s32.totalorder %s1588_s12, %s1369_s13 }
  0x43   : > { %p1366_p9 = pnand %p1364_p5, %p1352_p13  ;;  %p1372_p7 = scmp.lt.s32.totalorder %s1370_s27, %s1363_s30 }
  0x45   : > { %p1367_p12 = pneg %p1366_p9  ;;  %p1373_p4 = por %p1372_p7, %p1371_p3 }
  0x47   : > { %p1374_p8 = pnand %p1373_p4, %p1367_p12 }
  0x49   : > { %1377 = shalt.err (!%p1374_p8)
}
  0x4a   : > { %s2102_s23 = smov 128   ;;  %p2103_p13 = scmp.ne.s32.totalorder %s2097_s26, 0 }
  0x4b   : > { %1244 = dma.hbm_to_vmem [thread:$0]  (!%p1590_p10), %s1586_s10, 4096, %s1588_s12, %s1594_s16, %s2102_s23, %s2102_s23, %s1453_s14  }
  0x4c   : > { %231 = sbr.rel (%p2103_p13) target bundleno = 654 (0x28e), region = 40  ;;  %s1621_s6 = sand.u32 (!%p2103_p13), 1, %s1438_s19  }
  0x4d   : > { %s1146_s13 = sshll.u32 (!%p2103_p13), %s1621_s6, 8  ;;  %s234_s7 = scalar_lea.sflag (!%p2103_p13), [#allocation3], %s1621_s6 }
  0x4e   : > { %s1627_s15 = scalar_lea.vmem (!%p2103_p13), [#allocation2], %s1146_s13  ;;  %p2104_p4 = scmp.ne.s32.totalorder (!%p2103_p13), %s2095_s24, 0 }
  0x51   : > { %1421 = dma.done.wait (%p2104_p4), %s234_s7, 4096  }
  0x52   : > { %1423 = vsyncadd (%p2104_p4), %s234_s7, 4294963200  ;;  %p2105_p8 = scmp.eq.s32.totalorder %s1510_s22, 0 }
  0x54   : > { %1425 = dma.done.wait (%p2105_p8), [#allocation6], 8192   ;;  %p2106_p7 = pmov %p2105_p8 }
  0x55   : > { %v1455_v0 = vmov 0.0   ;;  %v337_v1 = vld [vmem:[#allocation5 + $0xf8] sm:$0xff]  ;;  %v336_v2 = vld [vmem:[#allocation5 + $0xf0] sm:$0xff]  ;;  %v335_v3 = vld [vmem:[#allocation5 + $0xe8] sm:$0xff]  ;;  %s1939_s12 = scalar_lea.vmem [#allocation8], %s1146_s13  ;;  %s1157_s16 = sshll.u32 %s1510_s22, 12 }
  0x56   : > { %1427 = vsyncadd (%p2106_p7), [#allocation6], 4294959104  ;;  %414 = vmatprep.mubr.f32.mxu0 %v1455_v0  ;;  %1158 = vmatprep.subr.mxu1 %v1455_v0  ;;  %v334_v4 = vld [vmem:[#allocation5 + $0xe0] sm:$0xff]  ;;  %v333_v5 = vld [vmem:[#allocation5 + $0xd8] sm:$0xff]  ;;  %s1045_s8 = sshll.u32 %s1939_s12, 4  ;;  %s2038_s11 = scalar_lea.hbm %s2089_s5, %s1157_s16  ;;  %s2040_s8 = int_to_ptr.vmem [resolvable:$true] %s1045_s8 }
  0x57   : > { %350 = vmatprep.subr.mxu0 %v337_v1  ;;  %v332_v6 = vld [vmem:[#allocation5 + $0xd0] sm:$0xff]  ;;  %v331_v7 = vld [vmem:[#allocation5 + $0xc8] sm:$0xff]  ;;  %v330_v8 = vld [vmem:[#allocation5 + $0xc0] sm:$0xff]  ;;  %s1032_s22 = scalar_lea.sflag [#allocation4], %s1621_s6  ;;  %s1378_s27 = scalar_lea.vmem %s2040_s8, 4096 }
  0x58   : > { %351 = vmatpush1.msra.mxu0 %v336_v2  ;;  %v329_v9 = vld [vmem:[#allocation5 + $0xb8] sm:$0xff]  ;;  %v328_v10 = vld [vmem:[#allocation5 + $0xb0] sm:$0xff]  ;;  %v327_v11 = vld [vmem:[#allocation5 + $0xa8] sm:$0xff]  ;;  %p1379_p10 = scmp.ne.s32.totalorder %s2040_s8, %s1378_s27  ;;  %p2107_p0 = scmp.ne.s32.totalorder %s2100_s29, 0 }
  0x59   : > { %352 = vmatprep.subr.mxu0 %v335_v3  ;;  %v326_v12 = vld [vmem:[#allocation5 + $0xa0] sm:$0xff]  ;;  %v325_v13 = vld [vmem:[#allocation5 + $0x98] sm:$0xff]  ;;  %v324_v14 = vld [vmem:[#allocation5 + $0x90] sm:$0xff]  ;;  %s1456_s23 = smov [#allocation8]  }
  0x5a   : > { %353 = vmatpush1.msra.mxu0 %v334_v4  ;;  %v323_v15 = vld [vmem:[#allocation5 + $0x88] sm:$0xff]  ;;  %v322_v16 = vld [vmem:[#allocation5 + $0x80] sm:$0xff]  ;;  %v321_v17 = vld [vmem:[#allocation5 + $0x78] sm:$0xff]  ;;  %p1380_p1 = pnand %p1379_p10, %p2107_p0  ;;  %s1382_s13 = sshll.u32 %s1456_s23, 4  ;;  %s1383_s13 = int_to_ptr.vmem [resolvable:$false] %s1382_s13 }
  0x5b   : > { %354 = vmatprep.subr.mxu0 %v333_v5  ;;  %v320_v18 = vld [vmem:[#allocation5 + $0x70] sm:$0xff]  ;;  %v319_v19 = vld [vmem:[#allocation5 + $0x68] sm:$0xff]  ;;  %v318_v20 = vld [vmem:[#allocation5 + $0x60] sm:$0xff]  ;;  %s1384_s7 = scalar_lea.vmem %s1383_s13, 8192  ;;  %p1385_p6 = scmp.lt.s32.totalorder %s2040_s8, %s1383_s13 }
  0x5c   : > { %355 = vmatpush1.msra.mxu0 %v332_v6  ;;  %v317_v21 = vld [vmem:[#allocation5 + $0x58] sm:$0xff]  ;;  %v316_v22 = vld [vmem:[#allocation5 + $0x50] sm:$0xff]  ;;  %v315_v23 = vld [vmem:[#allocation5 + $0x48] sm:$0xff]  ;;  %p1381_p2 = pneg %p1380_p1  ;;  %p1386_p11 = scmp.lt.s32.totalorder %s1384_s7, %s1378_s27 }
  0x5d   : > { %356 = vmatprep.subr.mxu0 %v331_v7  ;;  %v314_v24 = vld [vmem:[#allocation5 + $0x40] sm:$0xff]  ;;  %v313_v25 = vld [vmem:[#allocation5 + $0x38] sm:$0xff]  ;;  %v312_v26 = vld [vmem:[#allocation5 + $0x30] sm:$0xff] }
  0x5e   : > { %357 = vmatpush1.msra.mxu0 %v330_v8  ;;  %v311_v27 = vld [vmem:[#allocation5 + $0x28] sm:$0xff]  ;;  %v310_v28 = vld [vmem:[#allocation5 + $0x20] sm:$0xff]  ;;  %v309_v29 = vld [vmem:[#allocation5 + $0x18] sm:$0xff]  ;;  %p1387_p5 = por %p1386_p11, %p1385_p6 }
  0x5f   : > { %358 = vmatprep.subr.mxu0 %v329_v9  ;;  %v308_v30 = vld [vmem:[#allocation5 + $0x10] sm:$0xff]  ;;  %v307_v31 = vld [vmem:[#allocation5 + $0x8] sm:$0xff]  ;;  %v306_v32 = vld [vmem:[#allocation5] sm:$0xff] }
  0x60   : > { %359 = vmatpush1.msra.mxu0 %v328_v10  ;;  %v686_v33 = vld [vmem:[#allocation7 + $0x78] sm:$0xff]  ;;  %v274_v34 = vld [vmem:[%s1627_s15] sm:$0xff]  ;;  %v685_v35 = vld [vmem:[#allocation7 + $0x70] sm:$0xff]  ;;  %p1388_p9 = pnand %p1387_p5, %p1381_p2 }
  0x61   : > { %360 = vmatprep.subr.mxu0 %v327_v11  ;;  %1190 = vmatpush1.msra.mxu1 %v686_v33  ;;  %v275_v36 = vld [vmem:[%s1627_s15 + $0x8] sm:$0xff]  ;;  %v683_v38 = vld [vmem:[#allocation7 + $0x60] sm:$0xff]  ;;  %v1649_v39 = vld [vmem:[%s1627_s15 + $0x10] sm:$0xff] }
  0x62   : > { %361 = vmatpush1.msra.mxu0 %v326_v12  ;;  %1159 = vmatprep.subr.mxu1 %v1455_v0  ;;  %v684_v37 = vld [vmem:[#allocation7 + $0x68] sm:$0xff]  ;;  %v682_v40 = vld [vmem:[#allocation7 + $0x58] sm:$0xff]  ;;  %v681_v41 = vld [vmem:[#allocation7 + $0x50] sm:$0xff] }
  0x63   : > { %362 = vmatprep.subr.mxu0 %v325_v13  ;;  %1191 = vmatpush1.msra.mxu1 %v685_v35  ;;  %v1657_v42 = vld [vmem:[%s1627_s15 + $0x18] sm:$0xff]  ;;  %v680_v43 = vld [vmem:[#allocation7 + $0x48] sm:$0xff]  ;;  %v679_v44 = vld [vmem:[#allocation7 + $0x40] sm:$0xff] }
  0x64   : > { %363 = vmatpush1.msra.mxu0 %v324_v14  ;;  %1160 = vmatprep.subr.mxu1 %v1455_v0  ;;  %v1665_v45 = vld [vmem:[%s1627_s15 + $0x20] sm:$0xff]  ;;  %v678_v46 = vld [vmem:[#allocation7 + $0x38] sm:$0xff]  ;;  %v677_v47 = vld [vmem:[#allocation7 + $0x30] sm:$0xff] }
  0x65   : > { %364 = vmatprep.subr.mxu0 %v323_v15  ;;  %1192 = vmatpush1.msra.mxu1 %v684_v37  ;;  %v1673_v48 = vld [vmem:[%s1627_s15 + $0x28] sm:$0xff]  ;;  %v675_v50 = vld [vmem:[#allocation7 + $0x20] sm:$0xff]  ;;  %v1681_v51 = vld [vmem:[%s1627_s15 + $0x30] sm:$0xff] }
  0x66   : > { %365 = vmatpush1.msra.mxu0 %v322_v16  ;;  %1161 = vmatprep.subr.mxu1 %v1455_v0  ;;  %v676_v49 = vld [vmem:[#allocation7 + $0x28] sm:$0xff]  ;;  %v674_v52 = vld [vmem:[#allocation7 + $0x18] sm:$0xff]  ;;  %v673_v53 = vld [vmem:[#allocation7 + $0x10] sm:$0xff] }
  0x67   : > { %366 = vmatprep.subr.mxu0 %v321_v17  ;;  %1193 = vmatpush1.msra.mxu1 %v683_v38  ;;  %v1689_v54 = vld [vmem:[%s1627_s15 + $0x38] sm:$0xff]  ;;  %v672_v55 = vld [vmem:[#allocation7 + $0x8] sm:$0xff]  ;;  %v671_v56 = vld [vmem:[#allocation7] sm:$0xff] }
  0x68   : > { %367 = vmatpush1.msra.mxu0 %v320_v18  ;;  %1162 = vmatprep.subr.mxu1 %v1455_v0  ;;  %v1697_v57 = vld [vmem:[%s1627_s15 + $0x40] sm:$0xff]  ;;  %v702_v58 = vld [vmem:[#allocation7 + $0xf8] sm:$0xff]  ;;  %v701_v59 = vld [vmem:[#allocation7 + $0xf0] sm:$0xff] }
  0x69   : > { %368 = vmatprep.subr.mxu0 %v319_v19  ;;  %1194 = vmatpush1.msra.mxu1 %v682_v40  ;;  %v1705_v60 = vld [vmem:[%s1627_s15 + $0x48] sm:$0xff]  ;;  %v699_v62 = vld [vmem:[#allocation7 + $0xe0] sm:$0xff]  ;;  %v1713_v63 = vld [vmem:[%s1627_s15 + $0x50] sm:$0xff] }
  0x6a   : > { %369 = vmatpush1.msra.mxu0 %v318_v20  ;;  %1163 = vmatprep.subr.mxu1 %v1455_v0  ;;  %v700_v61 = vld [vmem:[#allocation7 + $0xe8] sm:$0xff]  ;;  %v698_v1 = vld [vmem:[#allocation7 + $0xd8] sm:$0xff]  ;;  %v697_v3 = vld [vmem:[#allocation7 + $0xd0] sm:$0xff] }
  0x6b   : > { %370 = vmatprep.subr.mxu0 %v317_v21  ;;  %1195 = vmatpush1.msra.mxu1 %v681_v41  ;;  %v1721_v2 = vld [vmem:[%s1627_s15 + $0x58] sm:$0xff]  ;;  %v1727_v4 = vld [vmem:[#allocation7 + $0xc8] sm:$0xff]  ;;  %v1731_v5 = vld [vmem:[%s1627_s15 + $0x60] sm:$0xff] }
  0x6c   : > { %371 = vmatpush1.msra.mxu0 %v316_v22  ;;  %1164 = vmatprep.subr.mxu1 %v1455_v0  ;;  %v695_v6 = vld [vmem:[#allocation7 + $0xc0] sm:$0xff]  ;;  %v1740_v7 = vld [vmem:[%s1627_s15 + $0x68] sm:$0xff]  ;;  %v694_v8 = vld [vmem:[#allocation7 + $0xb8] sm:$0xff] }
  0x6d   : > { %372 = vmatprep.subr.mxu0 %v315_v23  ;;  %1196 = vmatpush1.msra.mxu1 %v680_v43  ;;  %v693_v9 = vld [vmem:[#allocation7 + $0xb0] sm:$0xff]  ;;  %v692_v11 = vld [vmem:[#allocation7 + $0xa8] sm:$0xff]  ;;  %v1756_v12 = vld [vmem:[%s1627_s15 + $0x78] sm:$0xff] }
  0x6e   : > { %373 = vmatpush1.msra.mxu0 %v314_v24  ;;  %1165 = vmatprep.subr.mxu1 %v1455_v0  ;;  %v1748_v10 = vld [vmem:[%s1627_s15 + $0x70] sm:$0xff]  ;;  %v691_v13 = vld [vmem:[#allocation7 + $0xa0] sm:$0xff]  ;;  %v690_v15 = vld [vmem:[#allocation7 + $0x98] sm:$0xff] }
  0x6f   : > { %374 = vmatprep.subr.mxu0 %v313_v25  ;;  %1197 = vmatpush1.msra.mxu1 %v679_v44  ;;  %v1764_v14 = vld [vmem:[%s1627_s15 + $0x80] sm:$0xff]  ;;  %v1772_v16 = vld [vmem:[%s1627_s15 + $0x88] sm:$0xff]  ;;  %v689_v17 = vld [vmem:[#allocation7 + $0x90] sm:$0xff] }
  0x70   : > { %375 = vmatpush1.msra.mxu0 %v312_v26  ;;  %1166 = vmatprep.subr.mxu1 %v1455_v0  ;;  %v688_v18 = vld [vmem:[#allocation7 + $0x88] sm:$0xff]  ;;  %v1780_v19 = vld [vmem:[%s1627_s15 + $0x90] sm:$0xff]  ;;  %v687_v20 = vld [vmem:[#allocation7 + $0x80] sm:$0xff] }
  0x71   : > { %376 = vmatprep.subr.mxu0 %v311_v27  ;;  %1198 = vmatpush1.msra.mxu1 %v678_v46  ;;  %v1789_v21 = vld [vmem:[%s1627_s15 + $0x98] sm:$0xff]  ;;  %v1795_v22 = vld [vmem:[%s1627_s15 + $0xa0] sm:$0xff]  ;;  %v1802_v23 = vld [vmem:[%s1627_s15 + $0xa8] sm:$0xff] }
  0x72   : > { %377 = vmatpush1.msra.mxu0 %v310_v28  ;;  %1167 = vmatprep.subr.mxu1 %v1455_v0  ;;  %v1809_v24 = vld [vmem:[%s1627_s15 + $0xb0] sm:$0xff]  ;;  %v1816_v25 = vld [vmem:[%s1627_s15 + $0xb8] sm:$0xff]  ;;  %v1821_v26 = vld [vmem:[%s1627_s15 + $0xc0] sm:$0xff] }
  0x73   : > { %378 = vmatprep.subr.mxu0 %v309_v29  ;;  %1199 = vmatpush1.msra.mxu1 %v677_v47  ;;  %v1826_v27 = vld [vmem:[%s1627_s15 + $0xc8] sm:$0xff]  ;;  %v1831_v28 = vld [vmem:[%s1627_s15 + $0xd0] sm:$0xff]  ;;  %v1836_v29 = vld [vmem:[%s1627_s15 + $0xd8] sm:$0xff] }
  0x74   : > { %379 = vmatpush1.msra.mxu0 %v308_v30  ;;  %1168 = vmatprep.subr.mxu1 %v1455_v0  ;;  %v1841_v30 = vld [vmem:[%s1627_s15 + $0xe0] sm:$0xff] }
  0x75   : > { %380 = vmatprep.subr.mxu0 %v307_v31  ;;  %1200 = vmatpush1.msra.mxu1 %v676_v49  ;;  %v1846_v31 = vld [vmem:[%s1627_s15 + $0xe8] sm:$0xff] }
  0x76   : > { %381 = vmatpush1.msra.mxu0 %v306_v32  ;;  %1169 = vmatprep.subr.mxu1 %v1455_v0  ;;  %v1851_v32 = vld [vmem:[%s1627_s15 + $0xf0] sm:$0xff] }
  0x77   : > { %415 = vmatmul.mubr.f32.vlgmr.msra.gmra.mxu0 %v274_v34  ;;  %703 = vmatprep.subr.mxu0 %v1455_v0  ;;  %v340_v34 = vlaneseq }
  0x78   : > { %420 = vmatprep.mubr.f32.mxu0 %v1455_v0  ;;  %704 = vmatpush1.msra.mxu0 %v686_v33  ;;  %v1856_v33 = vld [vmem:[%s1627_s15 + $0xf8] sm:$0xff] }
  0x79   : > { %705 = vmatprep.subr.mxu0 %v1455_v0  ;;  %1201 = vmatpush1.msra.mxu1 %v675_v50 }
  0x7a   : > { %706 = vmatpush1.msra.mxu0 %v685_v35  ;;  %1170 = vmatprep.subr.mxu1 %v1455_v0  ;;  %v341_v35 = vshrl.u32 %v340_v34, 7 }
  0x7b   : > { %421 = vmatmul.mubr.f32.gmra.mxu0 %v275_v36  ;;  %707 = vmatprep.subr.mxu0 %v1455_v0 }
  0x7c   : > { %426 = vmatprep.mubr.f32.mxu0 %v1455_v0  ;;  %708 = vmatpush1.msra.mxu0 %v684_v37  ;;  %v342_v36 = vsub.s32 0, %v341_v35  ;;  %v338_v37 = vld [vmem:[%s2086_s2] sm:$0x3] }
  0x7d   : > { %709 = vmatprep.subr.mxu0 %v1455_v0  ;;  %1202 = vmatpush1.msra.mxu1 %v674_v52 }
  0x7e   : > { %710 = vmatpush1.msra.mxu0 %v683_v38  ;;  %1171 = vmatprep.subr.mxu1 %v1455_v0  ;;  %v346_v38 = vsub.s32 1, %v341_v35 }
  0x7f   : > { %427 = vmatmul.mubr.f32.gmra.mxu0 %v1649_v39  ;;  %711 = vmatprep.subr.mxu0 %v1455_v0 }
  0x80   : > { %432 = vmatprep.mubr.f32.mxu0 %v1455_v0  ;;  %712 = vmatpush1.msra.mxu0 %v682_v40  ;;  %v1862_v40 = vrot.slane %v338_v37, %v342_v36 }
  0x81   : > { %713 = vmatprep.subr.mxu0 %v1455_v0  ;;  %1203 = vmatpush1.msra.mxu1 %v673_v53 }
  0x82   : > { %714 = vmatpush1.msra.mxu0 %v681_v41  ;;  %1172 = vmatprep.subr.mxu1 %v1455_v0  ;;  %v1864_v41 = vrot.slane %v338_v37, %v346_v38 }
  0x83   : > { %433 = vmatmul.mubr.f32.gmra.mxu0 %v1657_v42  ;;  %715 = vmatprep.subr.mxu0 %v1455_v0 }
  0x84   : > { %438 = vmatprep.mubr.f32.mxu0 %v1455_v0  ;;  %716 = vmatpush1.msra.mxu0 %v680_v43 }
  0x85   : > { %717 = vmatprep.subr.mxu0 %v1455_v0  ;;  %1204 = vmatpush1.msra.mxu1 %v672_v55 }
  0x86   : > { %718 = vmatpush1.msra.mxu0 %v679_v44  ;;  %1173 = vmatprep.subr.mxu1 %v1455_v0 }
  0x87   : > { %439 = vmatmul.mubr.f32.gmra.mxu0 %v1665_v45  ;;  %719 = vmatprep.subr.mxu0 %v1455_v0 }
  0x88   : > { %444 = vmatprep.mubr.f32.mxu0 %v1455_v0  ;;  %720 = vmatpush1.msra.mxu0 %v678_v46 }
  0x89   : > { %721 = vmatprep.subr.mxu0 %v1455_v0  ;;  %1205 = vmatpush1.msra.mxu1 %v671_v56 }
  0x8a   : > { %722 = vmatpush1.msra.mxu0 %v677_v47  ;;  %1174 = vmatprep.subr.mxu1 %v1455_v0 }
  0x8b   : > { %445 = vmatmul.mubr.f32.gmra.mxu0 %v1673_v48  ;;  %723 = vmatprep.subr.mxu0 %v1455_v0 }
  0x8c   : > { %450 = vmatprep.mubr.f32.mxu0 %v1455_v0  ;;  %724 = vmatpush1.msra.mxu0 %v676_v49 }
  0x8d   : > { %725 = vmatprep.subr.mxu0 %v1455_v0  ;;  %1206 = vmatpush2.msra.mxu1 %v702_v58 }
  0x8e   : > { %726 = vmatpush1.msra.mxu0 %v675_v50  ;;  %1175 = vmatprep.subr.mxu1 %v1455_v0 }
  0x8f   : > { %451 = vmatmul.mubr.f32.gmra.mxu0 %v1681_v51  ;;  %727 = vmatprep.subr.mxu0 %v1455_v0 }
  0x90   : > { %456 = vmatprep.mubr.f32.mxu0 %v1455_v0  ;;  %728 = vmatpush1.msra.mxu0 %v674_v52 }
  0x91   : > { %729 = vmatprep.subr.mxu0 %v1455_v0  ;;  %1207 = vmatpush2.msra.mxu1 %v701_v59 }
  0x92   : > { %730 = vmatpush1.msra.mxu0 %v673_v53  ;;  %1176 = vmatprep.subr.mxu1 %v1455_v0 }
  0x93   : > { %457 = vmatmul.mubr.f32.gmra.mxu0 %v1689_v54  ;;  %731 = vmatprep.subr.mxu0 %v1455_v0 }
  0x94   : > { %462 = vmatprep.mubr.f32.mxu0 %v1455_v0  ;;  %732 = vmatpush1.msra.mxu0 %v672_v55 }
  0x95   : > { %733 = vmatprep.subr.mxu0 %v1455_v0  ;;  %1208 = vmatpush2.msra.mxu1 %v700_v61 }
  0x96   : > { %734 = vmatpush1.msra.mxu0 %v671_v56  ;;  %1177 = vmatprep.subr.mxu1 %v1455_v0 }
  0x97   : > { %463 = vmatmul.mubr.f32.gmra.mxu0 %v1697_v57  ;;  %735 = vmatprep.subr.mxu0 %v1455_v0 }
  0x98   : > { %468 = vmatprep.mubr.f32.mxu0 %v1455_v0  ;;  %736 = vmatpush2.msra.mxu0 %v702_v58 }
  0x99   : > { %737 = vmatprep.subr.mxu0 %v1455_v0  ;;  %1209 = vmatpush2.msra.mxu1 %v699_v62 }
  0x9a   : > { %738 = vmatpush2.msra.mxu0 %v701_v59  ;;  %1178 = vmatprep.subr.mxu1 %v1455_v0 }
  0x9b   : > { %469 = vmatmul.mubr.f32.gmra.mxu0 %v1705_v60  ;;  %739 = vmatprep.subr.mxu0 %v1455_v0 }
  0x9c   : > { %474 = vmatprep.mubr.f32.mxu0 %v1455_v0  ;;  %740 = vmatpush2.msra.mxu0 %v700_v61 }
  0x9d   : > { %741 = vmatprep.subr.mxu0 %v1455_v0  ;;  %1210 = vmatpush2.msra.mxu1 %v698_v1 }
  0x9e   : > { %742 = vmatpush2.msra.mxu0 %v699_v62  ;;  %1179 = vmatprep.subr.mxu1 %v1455_v0 }
  0x9f   : > { %475 = vmatmul.mubr.f32.gmra.mxu0 %v1713_v63  ;;  %743 = vmatprep.subr.mxu0 %v1455_v0 }
  0xa0   : > { %480 = vmatprep.mubr.f32.mxu0 %v1455_v0  ;;  %744 = vmatpush2.msra.mxu0 %v698_v1 }
  0xa1   : > { %745 = vmatprep.subr.mxu0 %v1455_v0  ;;  %1211 = vmatpush2.msra.mxu1 %v697_v3 }
  0xa2   : > { %746 = vmatpush2.msra.mxu0 %v697_v3  ;;  %1180 = vmatprep.subr.mxu1 %v1455_v0 }
  0xa3   : > { %481 = vmatmul.mubr.f32.gmra.mxu0 %v1721_v2  ;;  %747 = vmatprep.subr.mxu0 %v1455_v0 }
  0xa4   : > { %486 = vmatprep.mubr.f32.mxu0 %v1455_v0  ;;  %748 = vmatpush2.msra.mxu0 %v1727_v4 }
  0xa5   : > { %749 = vmatprep.subr.mxu0 %v1455_v0  ;;  %1212 = vmatpush2.msra.mxu1 %v1727_v4 }
  0xa6   : > { %750 = vmatpush2.msra.mxu0 %v695_v6  ;;  %1181 = vmatprep.subr.mxu1 %v1455_v0 }
  0xa7   : > { %487 = vmatmul.mubr.f32.gmra.mxu0 %v1731_v5  ;;  %751 = vmatprep.subr.mxu0 %v1455_v0 }
  0xa8   : > { %492 = vmatprep.mubr.f32.mxu0 %v1455_v0  ;;  %752 = vmatpush2.msra.mxu0 %v694_v8 }
  0xa9   : > { %753 = vmatprep.subr.mxu0 %v1455_v0  ;;  %1213 = vmatpush2.msra.mxu1 %v695_v6 }
  0xaa   : > { %754 = vmatpush2.msra.mxu0 %v693_v9  ;;  %1182 = vmatprep.subr.mxu1 %v1455_v0 }
  0xab   : > { %493 = vmatmul.mubr.f32.gmra.mxu0 %v1740_v7  ;;  %755 = vmatprep.subr.mxu0 %v1455_v0 }
  0xac   : > { %498 = vmatprep.mubr.f32.mxu0 %v1455_v0  ;;  %756 = vmatpush2.msra.mxu0 %v692_v11 }
  0xad   : > { %757 = vmatprep.subr.mxu0 %v1455_v0  ;;  %1214 = vmatpush2.msra.mxu1 %v694_v8 }
  0xae   : > { %758 = vmatpush2.msra.mxu0 %v691_v13  ;;  %1183 = vmatprep.subr.mxu1 %v1455_v0 }
  0xaf   : > { %499 = vmatmul.mubr.f32.gmra.mxu0 %v1748_v10  ;;  %759 = vmatprep.subr.mxu0 %v1455_v0 }
  0xb0   : > { %504 = vmatprep.mubr.f32.mxu0 %v1455_v0  ;;  %760 = vmatpush2.msra.mxu0 %v690_v15 }
  0xb1   : > { %761 = vmatprep.subr.mxu0 %v1455_v0  ;;  %1215 = vmatpush2.msra.mxu1 %v693_v9 }
  0xb2   : > { %762 = vmatpush2.msra.mxu0 %v689_v17  ;;  %1184 = vmatprep.subr.mxu1 %v1455_v0 }
  0xb3   : > { %505 = vmatmul.mubr.f32.gmra.mxu0 %v1756_v12  ;;  %763 = vmatprep.subr.mxu0 %v1455_v0 }
  0xb4   : > { %510 = vmatprep.mubr.f32.mxu0 %v1455_v0  ;;  %764 = vmatpush2.msra.mxu0 %v688_v18 }
  0xb5   : > { %765 = vmatprep.subr.mxu0 %v1455_v0  ;;  %1216 = vmatpush2.msra.mxu1 %v692_v11 }
  0xb6   : > { %766 = vmatpush2.msra.mxu0 %v687_v20  ;;  %1185 = vmatprep.subr.mxu1 %v1455_v0 }
  0xb7   : > { %511 = vmatmul.mubr.f32.gmra.mxu0 %v1764_v14  ;;  %1217 = vmatpush2.msra.mxu1 %v691_v13 }
  0xb8   : > { %516 = vmatprep.mubr.f32.mxu0 %v1455_v0  ;;  %1186 = vmatprep.subr.mxu1 %v1455_v0 }
  0xb9   : > { %1218 = vmatpush2.msra.mxu1 %v690_v15 }
  0xba   : > { %1187 = vmatprep.subr.mxu1 %v1455_v0 }
  0xbb   : > { %517 = vmatmul.mubr.f32.gmra.mxu0 %v1772_v16  ;;  %1219 = vmatpush2.msra.mxu1 %v689_v17 }
  0xbc   : > { %522 = vmatprep.mubr.f32.mxu0 %v1455_v0  ;;  %1188 = vmatprep.subr.mxu1 %v1455_v0 }
  0xbd   : > { %1220 = vmatpush2.msra.mxu1 %v688_v18 }
  0xbe   : > { %1189 = vmatprep.subr.mxu1 %v1455_v0 }
  0xbf   : > { %523 = vmatmul.mubr.f32.gmra.mxu0 %v1780_v19  ;;  %1221 = vmatpush2.msra.mxu1 %v687_v20 }
  0xc0   : > { %528 = vmatprep.mubr.f32.mxu0 %v1455_v0 }
  0xc3   : > { %529 = vmatmul.mubr.f32.gmra.mxu0 %v1789_v21 }
  0xc4   : > { %534 = vmatprep.mubr.f32.mxu0 %v1455_v0 }
  0xc7   : > { %535 = vmatmul.mubr.f32.gmra.mxu0 %v1795_v22 }
  0xc8   : > { %540 = vmatprep.mubr.f32.mxu0 %v1455_v0 }
  0xcb   : > { %541 = vmatmul.mubr.f32.gmra.mxu0 %v1802_v23 }
  0xcc   : > { %546 = vmatprep.mubr.f32.mxu0 %v1455_v0 }
  0xcf   : > { %547 = vmatmul.mubr.f32.gmra.mxu0 %v1809_v24 }
  0xd0   : > { %552 = vmatprep.mubr.f32.mxu0 %v1455_v0 }
  0xd3   : > { %553 = vmatmul.mubr.f32.gmra.mxu0 %v1816_v25 }
  0xd4   : > { %558 = vmatprep.mubr.f32.mxu0 %v1455_v0 }
  0xd7   : > { %559 = vmatmul.mubr.f32.gmra.mxu0 %v1821_v26 }
  0xd8   : > { %564 = vmatprep.mubr.f32.mxu0 %v1455_v0 }
  0xdb   : > { %565 = vmatmul.mubr.f32.gmra.mxu0 %v1826_v27 }
  0xdc   : > { %570 = vmatprep.mubr.f32.mxu0 %v1455_v0 }
  0xdf   : > { %571 = vmatmul.mubr.f32.gmra.mxu0 %v1831_v28 }
  0xe0   : > { %576 = vmatprep.mubr.f32.mxu0 %v1455_v0 }
  0xe3   : > { %577 = vmatmul.mubr.f32.gmra.mxu0 %v1836_v29 }
  0xe4   : > { %582 = vmatprep.mubr.f32.mxu0 %v1455_v0 }
  0xe7   : > { %583 = vmatmul.mubr.f32.gmra.mxu0 %v1841_v30 }
  0xe8   : > { %588 = vmatprep.mubr.f32.mxu0 %v1455_v0 }
  0xeb   : > { %589 = vmatmul.mubr.f32.gmra.mxu0 %v1846_v31 }
  0xec   : > { %594 = vmatprep.mubr.f32.mxu0 %v1455_v0 }
  0xef   : > { %595 = vmatmul.mubr.f32.gmra.mxu0 %v1851_v32 }
  0xf0   : > { %600 = vmatprep.mubr.f32.mxu0 %v1455_v0 }
  0xf3   : > { %601 = vmatmul.mubr.f32.gmra.mxu0 %v1856_v33 }
 0x137   : > { %v416_v43 = vpop.f32.mrf.mxu0 }
 0x138   : > { %v417_v44 = vadd.f32 %v416_v43, %v1862_v40 }
 0x139   : > { %v418_v0 = vpop.f32.mrf.mxu0 }
 0x13a   : > { %v419_v46 = vadd.f32 %v418_v0, %v1864_v41  ;;  %v607_v50 = vmax.f32 %v417_v44, 0.0 }
 0x13b   : > { %v422_v47 = vpop.f32.mrf.mxu0 }
 0x13c   : > { %v608_v49 = vmax.f32 %v419_v46, 0.0  ;;  %v423_v52 = vadd.f32 %v422_v47, %v1862_v40 }
 0x13d   : > { %v424_v53 = vpop.f32.mrf.mxu0 }
 0x13e   : > { %v425_v55 = vadd.f32 %v424_v53, %v1864_v41  ;;  %767 = vmatprep.mubr.f32.mxu0 %v608_v49  ;;  %v609_v59 = vmax.f32 %v423_v52, 0.0 }
 0x13f   : > { %v428_v56 = vpop.f32.mrf.mxu0  ;;  %768 = vmatmul.mubr.f32.vlgmr.msra.gmra.mxu0 %v607_v50 }
 0x140   : > { %v610_v58 = vmax.f32 %v425_v55, 0.0  ;;  %v429_v61 = vadd.f32 %v428_v56, %v1862_v40 }
 0x141   : > { %v430_v62 = vpop.f32.mrf.mxu0 }
 0x142   : > { %v431_v1 = vadd.f32 %v430_v62, %v1864_v41  ;;  %772 = vmatprep.mubr.f32.mxu0 %v610_v58  ;;  %v611_v6 = vmax.f32 %v429_v61, 0.0 }
 0x143   : > { %v434_v3 = vpop.f32.mrf.mxu0  ;;  %773 = vmatmul.mubr.f32.gmra.mxu0 %v609_v59 }
 0x144   : > { %v612_v4 = vmax.f32 %v431_v1, 0.0  ;;  %v435_v8 = vadd.f32 %v434_v3, %v1862_v40 }
 0x145   : > { %v436_v9 = vpop.f32.mrf.mxu0 }
 0x146   : > { %v437_v11 = vadd.f32 %v436_v9, %v1864_v41  ;;  %777 = vmatprep.mubr.f32.mxu0 %v612_v4  ;;  %v613_v17 = vmax.f32 %v435_v8, 0.0 }
 0x147   : > { %v440_v13 = vpop.f32.mrf.mxu0  ;;  %778 = vmatmul.mubr.f32.gmra.mxu0 %v611_v6 }
 0x148   : > { %v614_v15 = vmax.f32 %v437_v11, 0.0  ;;  %v441_v18 = vadd.f32 %v440_v13, %v1862_v40 }
 0x149   : > { %v442_v20 = vpop.f32.mrf.mxu0 }
 0x14a   : > { %782 = vmatprep.mubr.f32.mxu0 %v614_v15  ;;  %v443_v34 = vadd.f32 %v442_v20, %v1864_v41  ;;  %v615_v37 = vmax.f32 %v441_v18, 0.0 }
 0x14b   : > { %v446_v35 = vpop.f32.mrf.mxu0  ;;  %783 = vmatmul.mubr.f32.gmra.mxu0 %v613_v17 }
 0x14c   : > { %v616_v36 = vmax.f32 %v443_v34, 0.0  ;;  %v447_v38 = vadd.f32 %v446_v35, %v1862_v40 }
 0x14d   : > { %v448_v43 = vpop.f32.mrf.mxu0 }
 0x14e   : > { %v449_v44 = vadd.f32 %v448_v43, %v1864_v41  ;;  %787 = vmatprep.mubr.f32.mxu1 %v616_v36  ;;  %v617_v47 = vmax.f32 %v447_v38, 0.0 }
 0x14f   : > { %v452_v0 = vpop.f32.mrf.mxu0  ;;  %788 = vmatmul.mubr.f32.vlgmr.msra.gmra.mxu1 %v615_v37 }
 0x150   : > { %v618_v46 = vmax.f32 %v449_v44, 0.0  ;;  %v453_v49 = vadd.f32 %v452_v0, %v1862_v40 }
 0x151   : > { %v454_v50 = vpop.f32.mrf.mxu0 }
 0x152   : > { %v455_v52 = vadd.f32 %v454_v50, %v1864_v41  ;;  %792 = vmatprep.mubr.f32.mxu1 %v618_v46  ;;  %v619_v56 = vmax.f32 %v453_v49, 0.0 }
 0x153   : > { %v458_v53 = vpop.f32.mrf.mxu0  ;;  %793 = vmatmul.mubr.f32.gmra.mxu1 %v617_v47 }
 0x154   : > { %v620_v55 = vmax.f32 %v455_v52, 0.0  ;;  %v459_v58 = vadd.f32 %v458_v53, %v1862_v40 }
 0x155   : > { %v460_v59 = vpop.f32.mrf.mxu0 }
 0x156   : > { %v461_v61 = vadd.f32 %v460_v59, %v1864_v41  ;;  %797 = vmatprep.mubr.f32.mxu1 %v620_v55  ;;  %v621_v3 = vmax.f32 %v459_v58, 0.0 }
 0x157   : > { %v464_v62 = vpop.f32.mrf.mxu0  ;;  %798 = vmatmul.mubr.f32.gmra.mxu1 %v619_v56 }
 0x158   : > { %v622_v1 = vmax.f32 %v461_v61, 0.0  ;;  %v465_v4 = vadd.f32 %v464_v62, %v1862_v40 }
 0x159   : > { %v466_v6 = vpop.f32.mrf.mxu0 }
 0x15a   : > { %v467_v8 = vadd.f32 %v466_v6, %v1864_v41  ;;  %802 = vmatprep.mubr.f32.mxu1 %v622_v1  ;;  %v623_v13 = vmax.f32 %v465_v4, 0.0 }
 0x15b   : > { %v470_v9 = vpop.f32.mrf.mxu0  ;;  %803 = vmatmul.mubr.f32.gmra.mxu1 %v621_v3 }
 0x15c   : > { %v624_v11 = vmax.f32 %v467_v8, 0.0  ;;  %v471_v15 = vadd.f32 %v470_v9, %v1862_v40 }
 0x15d   : > { %v472_v17 = vpop.f32.mrf.mxu0 }
 0x15e   : > { %v473_v18 = vadd.f32 %v472_v17, %v1864_v41  ;;  %807 = vmatprep.mubr.f32.mxu1 %v624_v11  ;;  %v625_v35 = vmax.f32 %v471_v15, 0.0 }
 0x15f   : > { %v476_v20 = vpop.f32.mrf.mxu0  ;;  %808 = vmatmul.mubr.f32.gmra.mxu1 %v623_v13 }
 0x160   : > { %v626_v34 = vmax.f32 %v473_v18, 0.0  ;;  %v477_v36 = vadd.f32 %v476_v20, %v1862_v40 }
 0x161   : > { %v478_v37 = vpop.f32.mrf.mxu0 }
 0x162   : > { %v479_v38 = vadd.f32 %v478_v37, %v1864_v41  ;;  %812 = vmatprep.mubr.f32.mxu1 %v626_v34  ;;  %v627_v0 = vmax.f32 %v477_v36, 0.0 }
 0x163   : > { %v482_v43 = vpop.f32.mrf.mxu0  ;;  %813 = vmatmul.mubr.f32.gmra.mxu1 %v625_v35 }
 0x164   : > { %v628_v44 = vmax.f32 %v479_v38, 0.0  ;;  %v483_v46 = vadd.f32 %v482_v43, %v1862_v40 }
 0x165   : > { %v484_v47 = vpop.f32.mrf.mxu0 }
 0x166   : > { %v485_v49 = vadd.f32 %v484_v47, %v1864_v41  ;;  %817 = vmatprep.mubr.f32.mxu1 %v628_v44  ;;  %v629_v53 = vmax.f32 %v483_v46, 0.0 }
 0x167   : > { %v488_v50 = vpop.f32.mrf.mxu0  ;;  %818 = vmatmul.mubr.f32.gmra.mxu1 %v627_v0 }
 0x168   : > { %v630_v52 = vmax.f32 %v485_v49, 0.0  ;;  %v489_v55 = vadd.f32 %v488_v50, %v1862_v40 }
 0x169   : > { %v490_v56 = vpop.f32.mrf.mxu0 }
 0x16a   : > { %v491_v58 = vadd.f32 %v490_v56, %v1864_v41  ;;  %822 = vmatprep.mubr.f32.mxu1 %v630_v52  ;;  %v631_v62 = vmax.f32 %v489_v55, 0.0 }
 0x16b   : > { %v494_v59 = vpop.f32.mrf.mxu0  ;;  %823 = vmatmul.mubr.f32.gmra.mxu1 %v629_v53 }
 0x16c   : > { %v632_v61 = vmax.f32 %v491_v58, 0.0  ;;  %v495_v1 = vadd.f32 %v494_v59, %v1862_v40 }
 0x16d   : > { %v496_v3 = vpop.f32.mrf.mxu0 }
 0x16e   : > { %v497_v4 = vadd.f32 %v496_v3, %v1864_v41  ;;  %827 = vmatprep.mubr.f32.mxu1 %v632_v61  ;;  %v633_v9 = vmax.f32 %v495_v1, 0.0 }
 0x16f   : > { %v500_v6 = vpop.f32.mrf.mxu0  ;;  %828 = vmatmul.mubr.f32.gmra.mxu1 %v631_v62 }
 0x170   : > { %v634_v8 = vmax.f32 %v497_v4, 0.0  ;;  %v501_v11 = vadd.f32 %v500_v6, %v1862_v40 }
 0x171   : > { %v502_v13 = vpop.f32.mrf.mxu0 }
 0x172   : > { %v503_v15 = vadd.f32 %v502_v13, %v1864_v41  ;;  %832 = vmatprep.mubr.f32.mxu1 %v634_v8  ;;  %v635_v20 = vmax.f32 %v501_v11, 0.0 }
 0x173   : > { %v506_v17 = vpop.f32.mrf.mxu0  ;;  %833 = vmatmul.mubr.f32.gmra.mxu1 %v633_v9 }
 0x174   : > { %v636_v18 = vmax.f32 %v503_v15, 0.0  ;;  %v507_v34 = vadd.f32 %v506_v17, %v1862_v40 }
 0x175   : > { %v508_v35 = vpop.f32.mrf.mxu0 }
 0x176   : > { %v509_v36 = vadd.f32 %v508_v35, %v1864_v41  ;;  %837 = vmatprep.mubr.f32.mxu1 %v636_v18  ;;  %v637_v43 = vmax.f32 %v507_v34, 0.0 }
 0x177   : > { %v512_v37 = vpop.f32.mrf.mxu0  ;;  %838 = vmatmul.mubr.f32.gmra.mxu1 %v635_v20 }
 0x178   : > { %v638_v38 = vmax.f32 %v509_v36, 0.0  ;;  %v513_v44 = vadd.f32 %v512_v37, %v1862_v40 }
 0x179   : > { %v514_v0 = vpop.f32.mrf.mxu0 }
 0x17a   : > { %v515_v46 = vadd.f32 %v514_v0, %v1864_v41  ;;  %842 = vmatprep.mubr.f32.mxu1 %v638_v38  ;;  %v639_v50 = vmax.f32 %v513_v44, 0.0 }
 0x17b   : > { %v518_v47 = vpop.f32.mrf.mxu0  ;;  %843 = vmatmul.mubr.f32.gmra.mxu1 %v637_v43 }
 0x17c   : > { %v640_v49 = vmax.f32 %v515_v46, 0.0  ;;  %v519_v52 = vadd.f32 %v518_v47, %v1862_v40 }
 0x17d   : > { %v520_v53 = vpop.f32.mrf.mxu0 }
 0x17e   : > { %v521_v55 = vadd.f32 %v520_v53, %v1864_v41  ;;  %847 = vmatprep.mubr.f32.mxu1 %v640_v49  ;;  %v641_v59 = vmax.f32 %v519_v52, 0.0 }
 0x17f   : > { %v524_v56 = vpop.f32.mrf.mxu0  ;;  %848 = vmatmul.mubr.f32.gmra.mxu1 %v639_v50 }
 0x180   : > { %v642_v58 = vmax.f32 %v521_v55, 0.0  ;;  %v525_v61 = vadd.f32 %v524_v56, %v1862_v40 }
 0x181   : > { %v526_v62 = vpop.f32.mrf.mxu0 }
 0x182   : > { %v527_v1 = vadd.f32 %v526_v62, %v1864_v41  ;;  %852 = vmatprep.mubr.f32.mxu1 %v642_v58  ;;  %v643_v6 = vmax.f32 %v525_v61, 0.0 }
 0x183   : > { %v530_v3 = vpop.f32.mrf.mxu0  ;;  %853 = vmatmul.mubr.f32.gmra.mxu1 %v641_v59 }
 0x184   : > { %v644_v4 = vmax.f32 %v527_v1, 0.0  ;;  %v531_v8 = vadd.f32 %v530_v3, %v1862_v40 }
 0x185   : > { %v532_v9 = vpop.f32.mrf.mxu0 }
 0x186   : > { %v533_v11 = vadd.f32 %v532_v9, %v1864_v41  ;;  %857 = vmatprep.mubr.f32.mxu1 %v644_v4  ;;  %v645_v17 = vmax.f32 %v531_v8, 0.0 }
 0x187   : > { %v536_v13 = vpop.f32.mrf.mxu0  ;;  %858 = vmatmul.mubr.f32.gmra.mxu1 %v643_v6 }
 0x188   : > { %v646_v15 = vmax.f32 %v533_v11, 0.0  ;;  %v537_v18 = vadd.f32 %v536_v13, %v1862_v40 }
 0x189   : > { %v538_v20 = vpop.f32.mrf.mxu0 }
 0x18a   : > { %v539_v34 = vadd.f32 %v538_v20, %v1864_v41  ;;  %862 = vmatprep.mubr.f32.mxu1 %v646_v15  ;;  %v647_v37 = vmax.f32 %v537_v18, 0.0 }
 0x18b   : > { %v542_v35 = vpop.f32.mrf.mxu0  ;;  %863 = vmatmul.mubr.f32.gmra.mxu1 %v645_v17 }
 0x18c   : > { %v648_v36 = vmax.f32 %v539_v34, 0.0  ;;  %v543_v38 = vadd.f32 %v542_v35, %v1862_v40 }
 0x18d   : > { %v544_v43 = vpop.f32.mrf.mxu0 }
 0x18e   : > { %v545_v44 = vadd.f32 %v544_v43, %v1864_v41  ;;  %867 = vmatprep.mubr.f32.mxu1 %v648_v36  ;;  %v649_v47 = vmax.f32 %v543_v38, 0.0 }
 0x18f   : > { %v548_v0 = vpop.f32.mrf.mxu0  ;;  %868 = vmatmul.mubr.f32.gmra.mxu1 %v647_v37 }
 0x190   : > { %v650_v46 = vmax.f32 %v545_v44, 0.0  ;;  %v549_v49 = vadd.f32 %v548_v0, %v1862_v40 }
 0x191   : > { %v550_v50 = vpop.f32.mrf.mxu0 }
 0x192   : > { %v551_v52 = vadd.f32 %v550_v50, %v1864_v41  ;;  %872 = vmatprep.mubr.f32.mxu1 %v650_v46  ;;  %v651_v56 = vmax.f32 %v549_v49, 0.0 }
 0x193   : > { %v554_v53 = vpop.f32.mrf.mxu0  ;;  %873 = vmatmul.mubr.f32.gmra.mxu1 %v649_v47 }
 0x194   : > { %v652_v55 = vmax.f32 %v551_v52, 0.0  ;;  %v555_v58 = vadd.f32 %v554_v53, %v1862_v40 }
 0x195   : > { %v556_v59 = vpop.f32.mrf.mxu0 }
 0x196   : > { %v557_v61 = vadd.f32 %v556_v59, %v1864_v41  ;;  %877 = vmatprep.mubr.f32.mxu1 %v652_v55  ;;  %v653_v3 = vmax.f32 %v555_v58, 0.0 }
 0x197   : > { %v560_v62 = vpop.f32.mrf.mxu0  ;;  %878 = vmatmul.mubr.f32.gmra.mxu1 %v651_v56 }
 0x198   : > { %v654_v1 = vmax.f32 %v557_v61, 0.0  ;;  %v561_v4 = vadd.f32 %v560_v62, %v1862_v40 }
 0x199   : > { %v562_v6 = vpop.f32.mrf.mxu0 }
 0x19a   : > { %v563_v8 = vadd.f32 %v562_v6, %v1864_v41  ;;  %882 = vmatprep.mubr.f32.mxu1 %v654_v1  ;;  %v655_v13 = vmax.f32 %v561_v4, 0.0 }
 0x19b   : > { %v566_v9 = vpop.f32.mrf.mxu0  ;;  %883 = vmatmul.mubr.f32.gmra.mxu1 %v653_v3 }
 0x19c   : > { %v656_v11 = vmax.f32 %v563_v8, 0.0  ;;  %v567_v15 = vadd.f32 %v566_v9, %v1862_v40 }
 0x19d   : > { %v568_v17 = vpop.f32.mrf.mxu0 }
 0x19e   : > { %v569_v18 = vadd.f32 %v568_v17, %v1864_v41  ;;  %887 = vmatprep.mubr.f32.mxu1 %v656_v11  ;;  %v657_v35 = vmax.f32 %v567_v15, 0.0 }
 0x19f   : > { %v572_v20 = vpop.f32.mrf.mxu0  ;;  %888 = vmatmul.mubr.f32.gmra.mxu1 %v655_v13 }
 0x1a0   : > { %v658_v34 = vmax.f32 %v569_v18, 0.0  ;;  %v573_v36 = vadd.f32 %v572_v20, %v1862_v40 }
 0x1a1   : > { %v574_v37 = vpop.f32.mrf.mxu0 }
 0x1a2   : > { %v575_v38 = vadd.f32 %v574_v37, %v1864_v41  ;;  %892 = vmatprep.mubr.f32.mxu1 %v658_v34  ;;  %v659_v0 = vmax.f32 %v573_v36, 0.0 }
 0x1a3   : > { %v578_v43 = vpop.f32.mrf.mxu0  ;;  %893 = vmatmul.mubr.f32.gmra.mxu1 %v657_v35 }
 0x1a4   : > { %v660_v44 = vmax.f32 %v575_v38, 0.0  ;;  %v579_v46 = vadd.f32 %v578_v43, %v1862_v40 }
 0x1a5   : > { %v580_v47 = vpop.f32.mrf.mxu0 }
 0x1a6   : > { %v581_v49 = vadd.f32 %v580_v47, %v1864_v41  ;;  %897 = vmatprep.mubr.f32.mxu1 %v660_v44  ;;  %v661_v53 = vmax.f32 %v579_v46, 0.0  ;;  %v1933_v44 = vld [vmem:[%s2088_s4] ss:$0 sm:$0xff] }
 0x1a7   : > { %v584_v50 = vpop.f32.mrf.mxu0  ;;  %898 = vmatmul.mubr.f32.gmra.mxu1 %v659_v0  ;;  %v1296_v0 = vld [vmem:[%s1627_s15] sm:$0xff] }
 0x1a8   : > { %v662_v52 = vmax.f32 %v581_v49, 0.0  ;;  %v585_v55 = vadd.f32 %v584_v50, %v1862_v40 }
 0x1a9   : > { %v586_v56 = vpop.f32.mrf.mxu0 }
 0x1aa   : > { %v587_v58 = vadd.f32 %v586_v56, %v1864_v41  ;;  %902 = vmatprep.mubr.f32.mxu1 %v662_v52  ;;  %v663_v62 = vmax.f32 %v585_v55, 0.0 }
 0x1ab   : > { %v590_v59 = vpop.f32.mrf.mxu0  ;;  %903 = vmatmul.mubr.f32.gmra.mxu1 %v661_v53 }
 0x1ac   : > { %v664_v61 = vmax.f32 %v587_v58, 0.0  ;;  %v591_v1 = vadd.f32 %v590_v59, %v1862_v40 }
 0x1ad   : > { %v592_v3 = vpop.f32.mrf.mxu0 }
 0x1ae   : > { %v593_v4 = vadd.f32 %v592_v3, %v1864_v41  ;;  %907 = vmatprep.mubr.f32.mxu1 %v664_v61  ;;  %v665_v9 = vmax.f32 %v591_v1, 0.0 }
 0x1af   : > { %v596_v6 = vpop.f32.mrf.mxu0  ;;  %908 = vmatmul.mubr.f32.gmra.mxu1 %v663_v62 }
 0x1b0   : > { %v666_v8 = vmax.f32 %v593_v4, 0.0  ;;  %v597_v11 = vadd.f32 %v596_v6, %v1862_v40 }
 0x1b1   : > { %v598_v13 = vpop.f32.mrf.mxu0 }
 0x1b2   : > { %v599_v15 = vadd.f32 %v598_v13, %v1864_v41  ;;  %912 = vmatprep.mubr.f32.mxu1 %v666_v8  ;;  %v667_v20 = vmax.f32 %v597_v11, 0.0 }
 0x1b3   : > { %v602_v17 = vpop.f32.mrf.mxu0  ;;  %913 = vmatmul.mubr.f32.gmra.mxu1 %v665_v9 }
 0x1b4   : > { %v668_v18 = vmax.f32 %v599_v15, 0.0  ;;  %v603_v34 = vadd.f32 %v602_v17, %v1862_v40 }
 0x1b5   : > { %v604_v35 = vpop.f32.mrf.mxu0 }
 0x1b6   : > { %v605_v36 = vadd.f32 %v604_v35, %v1864_v41  ;;  %917 = vmatprep.mubr.f32.mxu1 %v668_v18  ;;  %v669_v38 = vmax.f32 %v603_v34, 0.0  ;;  %v1297_v41 = vld [vmem:[%s1627_s15 + $0x8] sm:$0xff] }
 0x1b7   : > { %918 = vmatmul.mubr.f32.gmra.mxu1 %v667_v20 }
 0x1b8   : > { %v670_v37 = vmax.f32 %v605_v36, 0.0 }
 0x1ba   : > { %922 = vmatprep.mubr.f32.mxu1 %v670_v37 }
 0x1bb   : > { %923 = vmatmul.mubr.f32.gmra.mxu1 %v669_v38 }
 0x1ff   : > { %v769_v43 = vpop.f32.mrf.mxu0 }
 0x200   : > { %v928_v46 = vadd.f32 %v1296_v0, %v769_v43 }
 0x201   : > { %v771_v40 = vpop.f32.mrf.mxu0 }
 0x202   : > { %v967_v47 = vadd.f32 %v1933_v44, %v928_v46 }
 0x203   : > { %v774_v49 = vpop.f32.mrf.mxu0 }
 0x204   : > { %999 = vst [vmem:[%s1939_s12] sm:$0xff] %v967_v47  ;;  %v929_v50 = vadd.f32 %v1297_v41, %v774_v49 }
 0x205   : > { %v776_v52 = vpop.f32.mrf.mxu0 }
 0x206   : > { %v968_v53 = vadd.f32 %v1933_v44, %v929_v50 }
 0x207   : > { %v779_v55 = vpop.f32.mrf.mxu0 }
 0x208   : > { %1000 = vst [vmem:[%s1939_s12 + $0x8] sm:$0xff] %v968_v53  ;;  %v930_v56 = vadd.f32 %v779_v55, %v1649_v39 }
 0x209   : > { %v781_v58 = vpop.f32.mrf.mxu0 }
 0x20a   : > { %v969_v59 = vadd.f32 %v1933_v44, %v930_v56 }
 0x20b   : > { %v784_v61 = vpop.f32.mrf.mxu0 }
 0x20c   : > { %1001 = vst [vmem:[%s1939_s12 + $0x10] sm:$0xff] %v969_v59  ;;  %v931_v62 = vadd.f32 %v784_v61, %v1657_v42 }
 0x20d   : > { %v786_v1 = vpop.f32.mrf.mxu0 }
 0x20e   : > { %v970_v3 = vadd.f32 %v1933_v44, %v931_v62 }
 0x20f   : > { %v789_v4 = vpop.f32.mrf.mxu1 }
 0x210   : > { %1002 = vst [vmem:[%s1939_s12 + $0x18] sm:$0xff] %v970_v3  ;;  %v932_v6 = vadd.f32 %v789_v4, %v1665_v45 }
 0x211   : > { %v791_v8 = vpop.f32.mrf.mxu1 }
 0x212   : > { %v971_v9 = vadd.f32 %v1933_v44, %v932_v6 }
 0x213   : > { %v794_v39 = vpop.f32.mrf.mxu1 }
 0x214   : > { %1003 = vst [vmem:[%s1939_s12 + $0x20] sm:$0xff] %v971_v9  ;;  %v933_v11 = vadd.f32 %v794_v39, %v1673_v48 }
 0x215   : > { %v796_v13 = vpop.f32.mrf.mxu1 }
 0x216   : > { %v972_v15 = vadd.f32 %v1933_v44, %v933_v11 }
 0x217   : > { %v799_v42 = vpop.f32.mrf.mxu1 }
 0x218   : > { %1004 = vst [vmem:[%s1939_s12 + $0x28] sm:$0xff] %v972_v15  ;;  %v934_v17 = vadd.f32 %v799_v42, %v1681_v51 }
 0x219   : > { %v801_v18 = vpop.f32.mrf.mxu1 }
 0x21a   : > { %v973_v20 = vadd.f32 %v1933_v44, %v934_v17 }
 0x21b   : > { %v804_v45 = vpop.f32.mrf.mxu1 }
 0x21c   : > { %1005 = vst [vmem:[%s1939_s12 + $0x30] sm:$0xff] %v973_v20  ;;  %v935_v34 = vadd.f32 %v804_v45, %v1689_v54 }
 0x21d   : > { %v806_v35 = vpop.f32.mrf.mxu1 }
 0x21e   : > { %v974_v36 = vadd.f32 %v1933_v44, %v935_v34 }
 0x21f   : > { %v809_v48 = vpop.f32.mrf.mxu1 }
 0x220   : > { %1006 = vst [vmem:[%s1939_s12 + $0x38] sm:$0xff] %v974_v36  ;;  %v936_v37 = vadd.f32 %v809_v48, %v1697_v57 }
 0x221   : > { %v811_v38 = vpop.f32.mrf.mxu1 }
 0x222   : > { %v975_v43 = vadd.f32 %v1933_v44, %v936_v37 }
 0x223   : > { %v814_v51 = vpop.f32.mrf.mxu1 }
 0x224   : > { %1007 = vst [vmem:[%s1939_s12 + $0x40] sm:$0xff] %v975_v43  ;;  %v937_v0 = vadd.f32 %v814_v51, %v1705_v60 }
 0x225   : > { %v816_v46 = vpop.f32.mrf.mxu1 }
 0x226   : > { %v976_v40 = vadd.f32 %v1933_v44, %v937_v0 }
 0x227   : > { %v819_v54 = vpop.f32.mrf.mxu1 }
 0x228   : > { %1008 = vst [vmem:[%s1939_s12 + $0x48] sm:$0xff] %v976_v40  ;;  %v938_v47 = vadd.f32 %v819_v54, %v1713_v63 }
 0x229   : > { %v821_v49 = vpop.f32.mrf.mxu1 }
 0x22a   : > { %v977_v41 = vadd.f32 %v1933_v44, %v938_v47 }
 0x22b   : > { %v824_v57 = vpop.f32.mrf.mxu1 }
 0x22c   : > { %1009 = vst [vmem:[%s1939_s12 + $0x50] sm:$0xff] %v977_v41  ;;  %v939_v50 = vadd.f32 %v824_v57, %v1721_v2 }
 0x22d   : > { %v826_v52 = vpop.f32.mrf.mxu1 }
 0x22e   : > { %v978_v53 = vadd.f32 %v1933_v44, %v939_v50 }
 0x22f   : > { %v829_v60 = vpop.f32.mrf.mxu1 }
 0x230   : > { %1010 = vst [vmem:[%s1939_s12 + $0x58] sm:$0xff] %v978_v53  ;;  %v940_v55 = vadd.f32 %v829_v60, %v1731_v5 }
 0x231   : > { %v831_v56 = vpop.f32.mrf.mxu1 }
 0x232   : > { %v979_v58 = vadd.f32 %v1933_v44, %v940_v55 }
 0x233   : > { %v834_v63 = vpop.f32.mrf.mxu1 }
 0x234   : > { %1011 = vst [vmem:[%s1939_s12 + $0x60] sm:$0xff] %v979_v58  ;;  %v941_v59 = vadd.f32 %v834_v63, %v1740_v7 }
 0x235   : > { %v836_v61 = vpop.f32.mrf.mxu1 }
 0x236   : > { %v980_v62 = vadd.f32 %v1933_v44, %v941_v59 }
 0x237   : > { %v839_v2 = vpop.f32.mrf.mxu1 }
 0x238   : > { %1012 = vst [vmem:[%s1939_s12 + $0x68] sm:$0xff] %v980_v62  ;;  %v942_v1 = vadd.f32 %v839_v2, %v1748_v10 }
 0x239   : > { %v841_v3 = vpop.f32.mrf.mxu1 }
 0x23a   : > { %v981_v4 = vadd.f32 %v1933_v44, %v942_v1 }
 0x23b   : > { %v844_v5 = vpop.f32.mrf.mxu1 }
 0x23c   : > { %1013 = vst [vmem:[%s1939_s12 + $0x70] sm:$0xff] %v981_v4  ;;  %v943_v6 = vadd.f32 %v844_v5, %v1756_v12 }
 0x23d   : > { %v846_v8 = vpop.f32.mrf.mxu1 }
 0x23e   : > { %v982_v9 = vadd.f32 %v1933_v44, %v943_v6 }
 0x23f   : > { %v849_v7 = vpop.f32.mrf.mxu1 }
 0x240   : > { %1014 = vst [vmem:[%s1939_s12 + $0x78] sm:$0xff] %v982_v9  ;;  %v944_v39 = vadd.f32 %v849_v7, %v1764_v14 }
 0x241   : > { %v851_v11 = vpop.f32.mrf.mxu1 }
 0x242   : > { %v983_v13 = vadd.f32 %v1933_v44, %v944_v39 }
 0x243   : > { %v854_v10 = vpop.f32.mrf.mxu1 }
 0x244   : > { %1015 = vst [vmem:[%s1939_s12 + $0x80] sm:$0xff] %v983_v13  ;;  %v945_v15 = vadd.f32 %v854_v10, %v1772_v16 }
 0x245   : > { %v856_v42 = vpop.f32.mrf.mxu1 }
 0x246   : > { %v984_v17 = vadd.f32 %v1933_v44, %v945_v15 }
 0x247   : > { %v859_v12 = vpop.f32.mrf.mxu1 }
 0x248   : > { %1016 = vst [vmem:[%s1939_s12 + $0x88] sm:$0xff] %v984_v17  ;;  %v946_v18 = vadd.f32 %v859_v12, %v1780_v19 }
 0x249   : > { %v861_v20 = vpop.f32.mrf.mxu1 }
 0x24a   : > { %v985_v45 = vadd.f32 %v1933_v44, %v946_v18 }
 0x24b   : > { %v864_v14 = vpop.f32.mrf.mxu1 }
 0x24c   : > { %1017 = vst [vmem:[%s1939_s12 + $0x90] sm:$0xff] %v985_v45  ;;  %v947_v34 = vadd.f32 %v864_v14, %v1789_v21 }
 0x24d   : > { %v866_v35 = vpop.f32.mrf.mxu1 }
 0x24e   : > { %v986_v36 = vadd.f32 %v1933_v44, %v947_v34 }
 0x24f   : > { %v869_v16 = vpop.f32.mrf.mxu1 }
 0x250   : > { %1018 = vst [vmem:[%s1939_s12 + $0x98] sm:$0xff] %v986_v36  ;;  %v948_v48 = vadd.f32 %v869_v16, %v1795_v22 }
 0x251   : > { %v871_v37 = vpop.f32.mrf.mxu1 }
 0x252   : > { %v987_v38 = vadd.f32 %v1933_v44, %v948_v48 }
 0x253   : > { %v874_v19 = vpop.f32.mrf.mxu1 }
 0x254   : > { %1019 = vst [vmem:[%s1939_s12 + $0xa0] sm:$0xff] %v987_v38  ;;  %v949_v43 = vadd.f32 %v874_v19, %v1802_v23 }
 0x255   : > { %v876_v51 = vpop.f32.mrf.mxu1 }
 0x256   : > { %v988_v0 = vadd.f32 %v1933_v44, %v949_v43 }
 0x257   : > { %v879_v21 = vpop.f32.mrf.mxu1 }
 0x258   : > { %1020 = vst [vmem:[%s1939_s12 + $0xa8] sm:$0xff] %v988_v0  ;;  %v950_v46 = vadd.f32 %v879_v21, %v1809_v24 }
 0x259   : > { %v881_v40 = vpop.f32.mrf.mxu1 }
 0x25a   : > { %v989_v54 = vadd.f32 %v1933_v44, %v950_v46 }
 0x25b   : > { %v884_v22 = vpop.f32.mrf.mxu1 }
 0x25c   : > { %1021 = vst [vmem:[%s1939_s12 + $0xb0] sm:$0xff] %v989_v54  ;;  %v951_v47 = vadd.f32 %v884_v22, %v1816_v25 }
 0x25d   : > { %v886_v49 = vpop.f32.mrf.mxu1 }
 0x25e   : > { %v990_v41 = vadd.f32 %v1933_v44, %v951_v47 }
 0x25f   : > { %v889_v23 = vpop.f32.mrf.mxu1 }
 0x260   : > { %1022 = vst [vmem:[%s1939_s12 + $0xb8] sm:$0xff] %v990_v41  ;;  %v952_v57 = vadd.f32 %v889_v23, %v1821_v26 }
 0x261   : > { %v891_v50 = vpop.f32.mrf.mxu1 }
 0x262   : > { %v991_v52 = vadd.f32 %v1933_v44, %v952_v57 }
 0x263   : > { %v894_v24 = vpop.f32.mrf.mxu1 }
 0x264   : > { %1023 = vst [vmem:[%s1939_s12 + $0xc0] sm:$0xff] %v991_v52  ;;  %v953_v53 = vadd.f32 %v894_v24, %v1826_v27 }
 0x265   : > { %v896_v60 = vpop.f32.mrf.mxu1 }
 0x266   : > { %v992_v55 = vadd.f32 %v1933_v44, %v953_v53 }
 0x267   : > { %v899_v25 = vpop.f32.mrf.mxu1 }
 0x268   : > { %1024 = vst [vmem:[%s1939_s12 + $0xc8] sm:$0xff] %v992_v55  ;;  %v954_v56 = vadd.f32 %v899_v25, %v1831_v28 }
 0x269   : > { %v901_v58 = vpop.f32.mrf.mxu1 }
 0x26a   : > { %v993_v63 = vadd.f32 %v1933_v44, %v954_v56 }
 0x26b   : > { %v904_v26 = vpop.f32.mrf.mxu1 }
 0x26c   : > { %1025 = vst [vmem:[%s1939_s12 + $0xd0] sm:$0xff] %v993_v63  ;;  %v955_v59 = vadd.f32 %v904_v26, %v1836_v29 }
 0x26d   : > { %v906_v61 = vpop.f32.mrf.mxu1 }
 0x26e   : > { %v994_v62 = vadd.f32 %v1933_v44, %v955_v59 }
 0x26f   : > { %v909_v27 = vpop.f32.mrf.mxu1 }
 0x270   : > { %1026 = vst [vmem:[%s1939_s12 + $0xd8] sm:$0xff] %v994_v62  ;;  %v956_v2 = vadd.f32 %v909_v27, %v1841_v30 }
 0x271   : > { %v911_v1 = vpop.f32.mrf.mxu1 }
 0x272   : > { %v995_v28 = vadd.f32 %v1933_v44, %v956_v2 }
 0x273   : > { %v914_v3 = vpop.f32.mrf.mxu1 }
 0x274   : > { %1027 = vst [vmem:[%s1939_s12 + $0xe0] sm:$0xff] %v995_v28  ;;  %v957_v4 = vadd.f32 %v914_v3, %v1846_v31 }
 0x275   : > { %v916_v5 = vpop.f32.mrf.mxu1 }
 0x276   : > { %v996_v29 = vadd.f32 %v1933_v44, %v957_v4 }
 0x277   : > { %v919_v6 = vpop.f32.mrf.mxu1 }
 0x278   : > { %1028 = vst [vmem:[%s1939_s12 + $0xe8] sm:$0xff] %v996_v29  ;;  %v958_v8 = vadd.f32 %v919_v6, %v1851_v32 }
 0x279   : > { %v921_v9 = vpop.f32.mrf.mxu1 }
 0x27a   : > { %v997_v30 = vadd.f32 %v1933_v44, %v958_v8 }
 0x27b   : > { %v924_v7 = vpop.f32.mrf.mxu1 }
 0x27c   : > { %1029 = vst [vmem:[%s1939_s12 + $0xf0] sm:$0xff] %v997_v30  ;;  %v959_v39 = vadd.f32 %v924_v7, %v1856_v33 }
 0x27d   : > { %v926_v31 = vpop.f32.mrf.mxu1 }
 0x27e   : > { %v998_v32 = vadd.f32 %v1933_v44, %v959_v39 }
 0x280   : > { %1030 = vst [vmem:[%s1939_s12 + $0xf8] sm:$0xff] %v998_v32 }
 0x281   : > { %1391 = shalt.err (!%p1388_p9)
}
 0x282   : > { %s1392_s15 = scalar_lea.hbm %s2038_s11, 4096  ;;  %s1396_s14 = scalar_lea.hbm %s2089_s5, 16384 }
 0x283   : > { %p1393_p12 = scmp.ne.s32.totalorder %s2038_s11, %s1392_s15  ;;  %p1397_p4 = scmp.lt.s32.totalorder %s2038_s11, %s2089_s5 }
 0x284   : > { %p1398_p8 = scmp.lt.s32.totalorder %s1396_s14, %s1392_s15 }
 0x285   : > { %p1394_p3 = pnand %p1393_p12, %p2107_p0 }
 0x286   : > { %p1399_p7 = por %p1398_p8, %p1397_p4 }
 0x287   : > { %p1395_p13 = pneg %p1394_p3 }
 0x289   : > { %p1400_p10 = pnand %p1399_p7, %p1395_p13 }
 0x28b   : > { %1403 = shalt.err (!%p1400_p10)
}
 0x28c   : > { %s1457_s16 = smov 128   ;;  %s1458_s9 = smov 8  }
 0x28d   : > { %1232 = dma.vmem_to_hbm [thread:$0]  (%p2107_p0), %s2040_s8, 4096, %s2038_s11, %s1032_s22, %s1457_s16, %s1457_s16, %s1458_s9  }
 0x28e PF: > { %p1254_p1 = scmp.ge.s32.totalorder %s1446_s21, 2  ;;  %s1060_s30 = sand.u32 1, %s1434_s18  }
 0x28f   : > { %p2108_p2 = scmp.ne.s32.totalorder %s2096_s25, 0  ;;  %s1061_s27 = scalar_lea.sflag [#allocation4], %s1060_s30 }
 0x291   : > { %p1246_p6 = pnand %p1254_p1, %p2108_p2 }
 0x293   : > { %p1247_p11 = pneg %p1246_p6 }
 0x295   : > { %1429 = dma.done.wait (%p1247_p11), %s1061_s27, 4096  }
 0x296   : > { %1431 = vsyncadd (%p1247_p11), %s1061_s27, 4294963200  ;;  %p19_p5 = scmp.ge.s32.totalorder %s1563_s17, 6   ;;  %s2109_s18 = smov %s1438_s19 }
 0x297   : > { %s2110_s19 = smov %s1442_s20  ;;  %s2111_s20 = smov %s1572_s28 }
 0x298   : > { %s2112_s21 = smov %s1563_s17  ;;  %21 = sbr.rel (!%p19_p5) target bundleno = 6 (0x6), region = 93 }
 0x29d   :  { %1066 = vsyncpa [#allocation3], 1 }
 0x29e   :  { %1068 = vsyncpa [#allocation3 + $0x1], 1 }
 0x29f   :  { %1069 = vsyncpa [#allocation6], 1 }
 0x2a0   :  { %1070 = vsyncpa [#allocation4], 1 }
 0x2a1   :  { %1072 = vsyncpa [#allocation4 + $0x1], 1 }

// kernel: tpu_custom_call.1
= control target key start
LH: loop header
LB: loop body
LE: loop exit
PB: predicated region body
PF: predicated region fallthrough
CT: control target
= control target key end

     0   :  { %10 = vsyncpa [#allocation3], 0  ;;  %s2084_s0 = inlined_call_operand.hbm [shape: f32[1024,128], index: 0, kind: input, shape index: {}]   ;;  %s2085_s1 = inlined_call_operand.hbm [shape: f32[128,256], index: 1, kind: input, shape index: {}]   ;;  %s2086_s2 = inlined_call_operand.vmem [shape: f32[1,256], index: 2, kind: input, shape index: {}]   ;;  %s2087_s3 = inlined_call_operand.hbm [shape: f32[256,128], index: 3, kind: input, shape index: {}]   ;;  %s2088_s4 = inlined_call_operand.vmem [shape: f32[1,128], index: 4, kind: input, shape index: {}]   ;;  %s2089_s5 = inlined_call_operand.hbm [shape: f32[1024,128], index: 5, kind: output, shape index: {}]  }
   0x1   :  { %12 = vsyncpa [#allocation3 + $0x1], 0 }
   0x2   :  { %13 = vsyncpa [#allocation6], 0 }
   0x3   :  { %14 = vsyncpa [#allocation4], 0 }
   0x4   :  { %16 = vsyncpa [#allocation4 + $0x1], 0  ;;  %s1489_s18 = smov 0   ;;  %s1491_s19 = smov 0  }
   0x5   :  { %s1493_s20 = smov 0   ;;  %s1495_s21 = smov 0  }
   0x6 LB: > { %s1510_s22 = sadd.s32 4294967295, %s1446_s21   ;;  %s1137_s23 = sadd.s32 4294967294, %s1446_s21   ;;  %s1446_s21 = sphi %s1495_s21, %s2112_s21   ;;  %s1442_s20 = sphi %s1493_s20, %s2111_s20   ;;  %s1438_s19 = sphi %s1491_s19, %s2110_s19   ;;  %s1434_s18 = sphi %s1489_s18, %s2109_s18  }
   0x7   : > { %p42_p0 = scmp.ne.s32.totalorder %s1438_s19, %s1434_s18  ;;  %p2090_p1 = scmp.eq.s32.totalorder %s1510_s22, 0 }
   0x8   : > { %p156_p3 = scmp.eq.s32.totalorder %s1137_s23, 3  ;;  %p1138_p5 = scmp.ge.s32.totalorder %s1446_s21, 1 }
   0x9   : > { %p1519_p4 = por %p2090_p1, %p42_p0  ;;  %p163_p7 = scmp.lt.s32.totalorder %s1446_s21, 5 }
   0xa   : > { %p1524_p6 = por %p156_p3, %p42_p0  ;;  %s1448_s27 = smov [#allocation5]  }
   0xb   : > { %s2095_s24 = scalar_select %p1519_p4, 1, 0 }
   0xc   : > { %s2096_s25 = scalar_select %p1524_p6, 1, 0 }
   0xd   : > { %p1529_p8 = pnand %p1138_p5, %p163_p7  ;;  %s175_s28 = sshll.u32 %s1448_s27, 4  ;;  %s176_s28 = int_to_ptr.vmem [resolvable:$true] %s175_s28 }
   0xe   : > { %s1449_s30 = smov [#allocation7]   ;;  %s1309_s7 = scalar_lea.vmem %s176_s28, 4096 }
   0xf   : > { %s2097_s26 = scalar_select %p1529_p8, 1, 0 }
  0x10   : > { %p1234_p9 = pneg %p1529_p8  ;;  %s191_s6 = sshll.u32 %s1449_s30, 4  ;;  %s192_s6 = int_to_ptr.vmem [resolvable:$true] %s191_s6 }
  0x11   : > { %p1310_p12 = scmp.ne.s32.totalorder %s176_s28, %s1309_s7  ;;  %p1317_p3 = scmp.lt.s32.totalorder %s176_s28, %s176_s28 }
  0x12   : > { %p1537_p10 = pnand %p1234_p9, %p2090_p1  ;;  %p1318_p5 = scmp.lt.s32.totalorder %s1309_s7, %s1309_s7 }
  0x14   : > { %p1300_p11 = pneg %p1537_p10  ;;  %p1319_p7 = por %p1318_p5, %p1317_p3 }
  0x16   : > { %p1312_p13 = pnand %p1310_p12, %p1300_p11 }
  0x18   : > { %p1313_p0 = pneg %p1312_p13 }
  0x1a   : > { %p1320_p9 = pnand %p1319_p7, %p1313_p0 }
  0x1c   : > { %1323 = shalt.err (!%p1320_p9)
}
  0x1d   : > { %s1450_s8 = smov 256   ;;  %s1451_s9 = smov 16  }
  0x1e   : > { %1237 = dma.hbm_to_vmem [thread:$0]  (!%p1537_p10), %s2085_s1, 4096, %s176_s28, [#allocation6], %s1450_s8, %s1450_s8, %s1451_s9  }
  0x1f   : > { %s1335_s12 = scalar_lea.vmem %s192_s6, 4096  ;;  %p1343_p2 = scmp.lt.s32.totalorder %s192_s6, %s192_s6 }
  0x20   : > { %p1336_p1 = scmp.ne.s32.totalorder %s192_s6, %s1335_s12  ;;  %p1344_p6 = scmp.lt.s32.totalorder %s1335_s12, %s1335_s12 }
  0x22   : > { %p1338_p12 = pnand %p1336_p1, %p1300_p11  ;;  %p1345_p3 = por %p1344_p6, %p1343_p2 }
  0x24   : > { %p1339_p13 = pneg %p1338_p12 }
  0x26   : > { %p1346_p0 = pnand %p1345_p3, %p1339_p13 }
  0x28   : > { %1349 = shalt.err (!%p1346_p0)
}
  0x29   : > { %s2091_s13 = smov 128   ;;  %s1453_s14 = smov 8  }
  0x2a   : > { %1240 = dma.hbm_to_vmem [thread:$0]  (!%p1537_p10), %s2087_s3, 4096, %s192_s6, [#allocation6], %s2091_s13, %s2091_s13, %s1453_s14  }
  0x2b   : > { %s1563_s17 = sadd.s32 1, %s1446_s21   ;;  %s29_s27 = sadd.s32 1, %s1442_s20 }
  0x2c   : > { %s26_s23 = ssub.s32 %s1446_s21, %s1563_s17  ;;  %p36_p2 = scmp.ne.s32.totalorder %s1442_s20, %s1438_s19 }
  0x2d   : > { %p27_p1 = scmp.eq.s32.totalorder %s26_s23, 0  ;;  %p37_p6 = scmp.eq.s32.totalorder %s1446_s21, 0 }
  0x2e   : > { %p2099_p5 = scmp.eq.s32.totalorder %s1510_s22, 3  ;;  %p1251_p9 = scmp.lt.s32.totalorder %s1446_s21, 4 }
  0x2f   : > { %s1572_s28 = scalar_select %p27_p1, %s1442_s20, %s29_s27  }
  0x30   : > { %p38_p11 = por %p37_p6, %p36_p2  ;;  %p1576_p7 = por %p2099_p5, %p36_p2 }
  0x31   : > { %s208_s30 = sand.u32 1, %s1442_s20   ;;  %s1156_s6 = sshll.u32 %s1446_s21, 12 }
  0x32   : > { %s2100_s29 = scalar_select %p1576_p7, 1, 0 }
  0x33   : > { %s1142_s7 = sshll.u32 %s208_s30, 8  ;;  %s1586_s10 = scalar_lea.hbm %s2084_s0, %s1156_s6 }
  0x34   : > { %s212_s11 = scalar_lea.vmem [#allocation2], %s1142_s7  ;;  %p1590_p10 = pnand %p1251_p9, %p38_p11 }
  0x35   : > { %s219_s12 = sshll.u32 %s212_s11, 4  ;;  %s1594_s16 = scalar_lea.sflag [#allocation3], %s208_s30  ;;  %s1588_s12 = int_to_ptr.vmem [resolvable:$true] %s219_s12 }
  0x36   : > { %s1350_s23 = scalar_lea.hbm %s1586_s10, 4096  ;;  %p1352_p13 = pneg %p1590_p10 }
  0x37   : > { %p1351_p12 = scmp.ne.s32.totalorder %s1586_s10, %s1350_s23  ;;  %s1355_s7 = scalar_lea.hbm %s2084_s0, 16384 }
  0x38   : > { %p1356_p1 = scmp.lt.s32.totalorder %s1586_s10, %s2084_s0  ;;  %p1357_p2 = scmp.lt.s32.totalorder %s1355_s7, %s1350_s23 }
  0x39   : > { %p1353_p3 = pnand %p1352_p13, %p1351_p12 }
  0x3a   : > { %p1358_p6 = por %p1357_p2, %p1356_p1 }
  0x3b   : > { %p1354_p0 = pneg %p1353_p3 }
  0x3d   : > { %p1359_p11 = pnand %p1358_p6, %p1354_p0 }
  0x3f   : > { %1362 = shalt.err (!%p1359_p11)
}
  0x40   : > { %s1363_s30 = scalar_lea.vmem %s1588_s12, 4096  ;;  %s1454_s11 = smov [#allocation2]  }
  0x41   : > { %p1364_p5 = scmp.ne.s32.totalorder %s1588_s12, %s1363_s30  ;;  %s1368_s13 = sshll.u32 %s1454_s11, 4  ;;  %s1369_s13 = int_to_ptr.vmem [resolvable:$false] %s1368_s13 }
  0x42   : > { %s1370_s27 = scalar_lea.vmem %s1369_s13, 8192  ;;  %p1371_p3 = scmp.lt.s32.totalorder %s1588_s12, %s1369_s13 }
  0x43   : > { %p1366_p9 = pnand %p1364_p5, %p1352_p13  ;;  %p1372_p7 = scmp.lt.s32.totalorder %s1370_s27, %s1363_s30 }
  0x45   : > { %p1367_p12 = pneg %p1366_p9  ;;  %p1373_p4 = por %p1372_p7, %p1371_p3 }
  0x47   : > { %p1374_p8 = pnand %p1373_p4, %p1367_p12 }
  0x49   : > { %1377 = shalt.err (!%p1374_p8)
}
  0x4a   : > { %s2102_s23 = smov 128   ;;  %p2103_p13 = scmp.ne.s32.totalorder %s2097_s26, 0 }
  0x4b   : > { %1244 = dma.hbm_to_vmem [thread:$0]  (!%p1590_p10), %s1586_s10, 4096, %s1588_s12, %s1594_s16, %s2102_s23, %s2102_s23, %s1453_s14  }
  0x4c   : > { %231 = sbr.rel (%p2103_p13) target bundleno = 654 (0x28e), region = 40  ;;  %s1621_s6 = sand.u32 (!%p2103_p13), 1, %s1438_s19  }
  0x4d   : > { %s1146_s13 = sshll.u32 (!%p2103_p13), %s1621_s6, 8  ;;  %s234_s7 = scalar_lea.sflag (!%p2103_p13), [#allocation3], %s1621_s6 }
  0x4e   : > { %s1627_s15 = scalar_lea.vmem (!%p2103_p13), [#allocation2], %s1146_s13  ;;  %p2104_p4 = scmp.ne.s32.totalorder (!%p2103_p13), %s2095_s24, 0 }
  0x51   : > { %1421 = dma.done.wait (%p2104_p4), %s234_s7, 4096  }
  0x52   : > { %1423 = vsyncadd (%p2104_p4), %s234_s7, 4294963200  ;;  %p2105_p8 = scmp.eq.s32.totalorder %s1510_s22, 0 }
  0x54   : > { %1425 = dma.done.wait (%p2105_p8), [#allocation6], 8192   ;;  %p2106_p7 = pmov %p2105_p8 }
  0x55   : > { %v1455_v0 = vmov 0.0   ;;  %v337_v1 = vld [vmem:[#allocation5 + $0xf8] sm:$0xff]  ;;  %v336_v2 = vld [vmem:[#allocation5 + $0xf0] sm:$0xff]  ;;  %v335_v3 = vld [vmem:[#allocation5 + $0xe8] sm:$0xff]  ;;  %s1939_s12 = scalar_lea.vmem [#allocation8], %s1146_s13  ;;  %s1157_s16 = sshll.u32 %s1510_s22, 12 }
  0x56   : > { %1427 = vsyncadd (%p2106_p7), [#allocation6], 4294959104  ;;  %414 = vmatprep.mubr.f32.mxu0 %v1455_v0  ;;  %1158 = vmatprep.subr.mxu1 %v1455_v0  ;;  %v334_v4 = vld [vmem:[#allocation5 + $0xe0] sm:$0xff]  ;;  %v333_v5 = vld [vmem:[#allocation5 + $0xd8] sm:$0xff]  ;;  %s1045_s8 = sshll.u32 %s1939_s12, 4  ;;  %s2038_s11 = scalar_lea.hbm %s2089_s5, %s1157_s16  ;;  %s2040_s8 = int_to_ptr.vmem [resolvable:$true] %s1045_s8 }
  0x57   : > { %350 = vmatprep.subr.mxu0 %v337_v1  ;;  %v332_v6 = vld [vmem:[#allocation5 + $0xd0] sm:$0xff]  ;;  %v331_v7 = vld [vmem:[#allocation5 + $0xc8] sm:$0xff]  ;;  %v330_v8 = vld [vmem:[#allocation5 + $0xc0] sm:$0xff]  ;;  %s1032_s22 = scalar_lea.sflag [#allocation4], %s1621_s6  ;;  %s1378_s27 = scalar_lea.vmem %s2040_s8, 4096 }
  0x58   : > { %351 = vmatpush1.msra.mxu0 %v336_v2  ;;  %v329_v9 = vld [vmem:[#allocation5 + $0xb8] sm:$0xff]  ;;  %v328_v10 = vld [vmem:[#allocation5 + $0xb0] sm:$0xff]  ;;  %v327_v11 = vld [vmem:[#allocation5 + $0xa8] sm:$0xff]  ;;  %p1379_p10 = scmp.ne.s32.totalorder %s2040_s8, %s1378_s27  ;;  %p2107_p0 = scmp.ne.s32.totalorder %s2100_s29, 0 }
  0x59   : > { %352 = vmatprep.subr.mxu0 %v335_v3  ;;  %v326_v12 = vld [vmem:[#allocation5 + $0xa0] sm:$0xff]  ;;  %v325_v13 = vld [vmem:[#allocation5 + $0x98] sm:$0xff]  ;;  %v324_v14 = vld [vmem:[#allocation5 + $0x90] sm:$0xff]  ;;  %s1456_s23 = smov [#allocation8]  }
  0x5a   : > { %353 = vmatpush1.msra.mxu0 %v334_v4  ;;  %v323_v15 = vld [vmem:[#allocation5 + $0x88] sm:$0xff]  ;;  %v322_v16 = vld [vmem:[#allocation5 + $0x80] sm:$0xff]  ;;  %v321_v17 = vld [vmem:[#allocation5 + $0x78] sm:$0xff]  ;;  %p1380_p1 = pnand %p1379_p10, %p2107_p0  ;;  %s1382_s13 = sshll.u32 %s1456_s23, 4  ;;  %s1383_s13 = int_to_ptr.vmem [resolvable:$false] %s1382_s13 }
  0x5b   : > { %354 = vmatprep.subr.mxu0 %v333_v5  ;;  %v320_v18 = vld [vmem:[#allocation5 + $0x70] sm:$0xff]  ;;  %v319_v19 = vld [vmem:[#allocation5 + $0x68] sm:$0xff]  ;;  %v318_v20 = vld [vmem:[#allocation5 + $0x60] sm:$0xff]  ;;  %s1384_s7 = scalar_lea.vmem %s1383_s13, 8192  ;;  %p1385_p6 = scmp.lt.s32.totalorder %s2040_s8, %s1383_s13 }
  0x5c   : > { %355 = vmatpush1.msra.mxu0 %v332_v6  ;;  %v317_v21 = vld [vmem:[#allocation5 + $0x58] sm:$0xff]  ;;  %v316_v22 = vld [vmem:[#allocation5 + $0x50] sm:$0xff]  ;;  %v315_v23 = vld [vmem:[#allocation5 + $0x48] sm:$0xff]  ;;  %p1381_p2 = pneg %p1380_p1  ;;  %p1386_p11 = scmp.lt.s32.totalorder %s1384_s7, %s1378_s27 }
  0x5d   : > { %356 = vmatprep.subr.mxu0 %v331_v7  ;;  %v314_v24 = vld [vmem:[#allocation5 + $0x40] sm:$0xff]  ;;  %v313_v25 = vld [vmem:[#allocation5 + $0x38] sm:$0xff]  ;;  %v312_v26 = vld [vmem:[#allocation5 + $0x30] sm:$0xff] }
  0x5e   : > { %357 = vmatpush1.msra.mxu0 %v330_v8  ;;  %v311_v27 = vld [vmem:[#allocation5 + $0x28] sm:$0xff]  ;;  %v310_v28 = vld [vmem:[#allocation5 + $0x20] sm:$0xff]  ;;  %v309_v29 = vld [vmem:[#allocation5 + $0x18] sm:$0xff]  ;;  %p1387_p5 = por %p1386_p11, %p1385_p6 }
  0x5f   : > { %358 = vmatprep.subr.mxu0 %v329_v9  ;;  %v308_v30 = vld [vmem:[#allocation5 + $0x10] sm:$0xff]  ;;  %v307_v31 = vld [vmem:[#allocation5 + $0x8] sm:$0xff]  ;;  %v306_v32 = vld [vmem:[#allocation5] sm:$0xff] }
  0x60   : > { %359 = vmatpush1.msra.mxu0 %v328_v10  ;;  %v686_v33 = vld [vmem:[#allocation7 + $0x78] sm:$0xff]  ;;  %v274_v34 = vld [vmem:[%s1627_s15] sm:$0xff]  ;;  %v685_v35 = vld [vmem:[#allocation7 + $0x70] sm:$0xff]  ;;  %p1388_p9 = pnand %p1387_p5, %p1381_p2 }
  0x61   : > { %360 = vmatprep.subr.mxu0 %v327_v11  ;;  %1190 = vmatpush1.msra.mxu1 %v686_v33  ;;  %v275_v36 = vld [vmem:[%s1627_s15 + $0x8] sm:$0xff]  ;;  %v683_v38 = vld [vmem:[#allocation7 + $0x60] sm:$0xff]  ;;  %v1649_v39 = vld [vmem:[%s1627_s15 + $0x10] sm:$0xff] }
  0x62   : > { %361 = vmatpush1.msra.mxu0 %v326_v12  ;;  %1159 = vmatprep.subr.mxu1 %v1455_v0  ;;  %v684_v37 = vld [vmem:[#allocation7 + $0x68] sm:$0xff]  ;;  %v682_v40 = vld [vmem:[#allocation7 + $0x58] sm:$0xff]  ;;  %v681_v41 = vld [vmem:[#allocation7 + $0x50] sm:$0xff] }
  0x63   : > { %362 = vmatprep.subr.mxu0 %v325_v13  ;;  %1191 = vmatpush1.msra.mxu1 %v685_v35  ;;  %v1657_v42 = vld [vmem:[%s1627_s15 + $0x18] sm:$0xff]  ;;  %v680_v43 = vld [vmem:[#allocation7 + $0x48] sm:$0xff]  ;;  %v679_v44 = vld [vmem:[#allocation7 + $0x40] sm:$0xff] }
  0x64   : > { %363 = vmatpush1.msra.mxu0 %v324_v14  ;;  %1160 = vmatprep.subr.mxu1 %v1455_v0  ;;  %v1665_v45 = vld [vmem:[%s1627_s15 + $0x20] sm:$0xff]  ;;  %v678_v46 = vld [vmem:[#allocation7 + $0x38] sm:$0xff]  ;;  %v677_v47 = vld [vmem:[#allocation7 + $0x30] sm:$0xff] }
  0x65   : > { %364 = vmatprep.subr.mxu0 %v323_v15  ;;  %1192 = vmatpush1.msra.mxu1 %v684_v37  ;;  %v1673_v48 = vld [vmem:[%s1627_s15 + $0x28] sm:$0xff]  ;;  %v675_v50 = vld [vmem:[#allocation7 + $0x20] sm:$0xff]  ;;  %v1681_v51 = vld [vmem:[%s1627_s15 + $0x30] sm:$0xff] }
  0x66   : > { %365 = vmatpush1.msra.mxu0 %v322_v16  ;;  %1161 = vmatprep.subr.mxu1 %v1455_v0  ;;  %v676_v49 = vld [vmem:[#allocation7 + $0x28] sm:$0xff]  ;;  %v674_v52 = vld [vmem:[#allocation7 + $0x18] sm:$0xff]  ;;  %v673_v53 = vld [vmem:[#allocation7 + $0x10] sm:$0xff] }
  0x67   : > { %366 = vmatprep.subr.mxu0 %v321_v17  ;;  %1193 = vmatpush1.msra.mxu1 %v683_v38  ;;  %v1689_v54 = vld [vmem:[%s1627_s15 + $0x38] sm:$0xff]  ;;  %v672_v55 = vld [vmem:[#allocation7 + $0x8] sm:$0xff]  ;;  %v671_v56 = vld [vmem:[#allocation7] sm:$0xff] }
  0x68   : > { %367 = vmatpush1.msra.mxu0 %v320_v18  ;;  %1162 = vmatprep.subr.mxu1 %v1455_v0  ;;  %v1697_v57 = vld [vmem:[%s1627_s15 + $0x40] sm:$0xff]  ;;  %v702_v58 = vld [vmem:[#allocation7 + $0xf8] sm:$0xff]  ;;  %v701_v59 = vld [vmem:[#allocation7 + $0xf0] sm:$0xff] }
  0x69   : > { %368 = vmatprep.subr.mxu0 %v319_v19  ;;  %1194 = vmatpush1.msra.mxu1 %v682_v40  ;;  %v1705_v60 = vld [vmem:[%s1627_s15 + $0x48] sm:$0xff]  ;;  %v699_v62 = vld [vmem:[#allocation7 + $0xe0] sm:$0xff]  ;;  %v1713_v63 = vld [vmem:[%s1627_s15 + $0x50] sm:$0xff] }
  0x6a   : > { %369 = vmatpush1.msra.mxu0 %v318_v20  ;;  %1163 = vmatprep.subr.mxu1 %v1455_v0  ;;  %v700_v61 = vld [vmem:[#allocation7 + $0xe8] sm:$0xff]  ;;  %v698_v1 = vld [vmem:[#allocation7 + $0xd8] sm:$0xff]  ;;  %v697_v3 = vld [vmem:[#allocation7 + $0xd0] sm:$0xff] }
  0x6b   : > { %370 = vmatprep.subr.mxu0 %v317_v21  ;;  %1195 = vmatpush1.msra.mxu1 %v681_v41  ;;  %v1721_v2 = vld [vmem:[%s1627_s15 + $0x58] sm:$0xff]  ;;  %v1727_v4 = vld [vmem:[#allocation7 + $0xc8] sm:$0xff]  ;;  %v1731_v5 = vld [vmem:[%s1627_s15 + $0x60] sm:$0xff] }
  0x6c   : > { %371 = vmatpush1.msra.mxu0 %v316_v22  ;;  %1164 = vmatprep.subr.mxu1 %v1455_v0  ;;  %v695_v6 = vld [vmem:[#allocation7 + $0xc0] sm:$0xff]  ;;  %v1740_v7 = vld [vmem:[%s1627_s15 + $0x68] sm:$0xff]  ;;  %v694_v8 = vld [vmem:[#allocation7 + $0xb8] sm:$0xff] }
  0x6d   : > { %372 = vmatprep.subr.mxu0 %v315_v23  ;;  %1196 = vmatpush1.msra.mxu1 %v680_v43  ;;  %v693_v9 = vld [vmem:[#allocation7 + $0xb0] sm:$0xff]  ;;  %v692_v11 = vld [vmem:[#allocation7 + $0xa8] sm:$0xff]  ;;  %v1756_v12 = vld [vmem:[%s1627_s15 + $0x78] sm:$0xff] }
  0x6e   : > { %373 = vmatpush1.msra.mxu0 %v314_v24  ;;  %1165 = vmatprep.subr.mxu1 %v1455_v0  ;;  %v1748_v10 = vld [vmem:[%s1627_s15 + $0x70] sm:$0xff]  ;;  %v691_v13 = vld [vmem:[#allocation7 + $0xa0] sm:$0xff]  ;;  %v690_v15 = vld [vmem:[#allocation7 + $0x98] sm:$0xff] }
  0x6f   : > { %374 = vmatprep.subr.mxu0 %v313_v25  ;;  %1197 = vmatpush1.msra.mxu1 %v679_v44  ;;  %v1764_v14 = vld [vmem:[%s1627_s15 + $0x80] sm:$0xff]  ;;  %v1772_v16 = vld [vmem:[%s1627_s15 + $0x88] sm:$0xff]  ;;  %v689_v17 = vld [vmem:[#allocation7 + $0x90] sm:$0xff] }
  0x70   : > { %375 = vmatpush1.msra.mxu0 %v312_v26  ;;  %1166 = vmatprep.subr.mxu1 %v1455_v0  ;;  %v688_v18 = vld [vmem:[#allocation7 + $0x88] sm:$0xff]  ;;  %v1780_v19 = vld [vmem:[%s1627_s15 + $0x90] sm:$0xff]  ;;  %v687_v20 = vld [vmem:[#allocation7 + $0x80] sm:$0xff] }
  0x71   : > { %376 = vmatprep.subr.mxu0 %v311_v27  ;;  %1198 = vmatpush1.msra.mxu1 %v678_v46  ;;  %v1789_v21 = vld [vmem:[%s1627_s15 + $0x98] sm:$0xff]  ;;  %v1795_v22 = vld [vmem:[%s1627_s15 + $0xa0] sm:$0xff]  ;;  %v1802_v23 = vld [vmem:[%s1627_s15 + $0xa8] sm:$0xff] }
  0x72   : > { %377 = vmatpush1.msra.mxu0 %v310_v28  ;;  %1167 = vmatprep.subr.mxu1 %v1455_v0  ;;  %v1809_v24 = vld [vmem:[%s1627_s15 + $0xb0] sm:$0xff]  ;;  %v1816_v25 = vld [vmem:[%s1627_s15 + $0xb8] sm:$0xff]  ;;  %v1821_v26 = vld [vmem:[%s1627_s15 + $0xc0] sm:$0xff] }
  0x73   : > { %378 = vmatprep.subr.mxu0 %v309_v29  ;;  %1199 = vmatpush1.msra.mxu1 %v677_v47  ;;  %v1826_v27 = vld [vmem:[%s1627_s15 + $0xc8] sm:$0xff]  ;;  %v1831_v28 = vld [vmem:[%s1627_s15 + $0xd0] sm:$0xff]  ;;  %v1836_v29 = vld [vmem:[%s1627_s15 + $0xd8] sm:$0xff] }
  0x74   : > { %379 = vmatpush1.msra.mxu0 %v308_v30  ;;  %1168 = vmatprep.subr.mxu1 %v1455_v0  ;;  %v1841_v30 = vld [vmem:[%s1627_s15 + $0xe0] sm:$0xff] }
  0x75   : > { %380 = vmatprep.subr.mxu0 %v307_v31  ;;  %1200 = vmatpush1.msra.mxu1 %v676_v49  ;;  %v1846_v31 = vld [vmem:[%s1627_s15 + $0xe8] sm:$0xff] }
  0x76   : > { %381 = vmatpush1.msra.mxu0 %v306_v32  ;;  %1169 = vmatprep.subr.mxu1 %v1455_v0  ;;  %v1851_v32 = vld [vmem:[%s1627_s15 + $0xf0] sm:$0xff] }
  0x77   : > { %415 = vmatmul.mubr.f32.vlgmr.msra.gmra.mxu0 %v274_v34  ;;  %703 = vmatprep.subr.mxu0 %v1455_v0  ;;  %v340_v34 = vlaneseq }
  0x78   : > { %420 = vmatprep.mubr.f32.mxu0 %v1455_v0  ;;  %704 = vmatpush1.msra.mxu0 %v686_v33  ;;  %v1856_v33 = vld [vmem:[%s1627_s15 + $0xf8] sm:$0xff] }
  0x79   : > { %705 = vmatprep.subr.mxu0 %v1455_v0  ;;  %1201 = vmatpush1.msra.mxu1 %v675_v50 }
  0x7a   : > { %706 = vmatpush1.msra.mxu0 %v685_v35  ;;  %1170 = vmatprep.subr.mxu1 %v1455_v0  ;;  %v341_v35 = vshrl.u32 %v340_v34, 7 }
  0x7b   : > { %421 = vmatmul.mubr.f32.gmra.mxu0 %v275_v36  ;;  %707 = vmatprep.subr.mxu0 %v1455_v0 }
  0x7c   : > { %426 = vmatprep.mubr.f32.mxu0 %v1455_v0  ;;  %708 = vmatpush1.msra.mxu0 %v684_v37  ;;  %v342_v36 = vsub.s32 0, %v341_v35  ;;  %v338_v37 = vld [vmem:[%s2086_s2] sm:$0x3] }
  0x7d   : > { %709 = vmatprep.subr.mxu0 %v1455_v0  ;;  %1202 = vmatpush1.msra.mxu1 %v674_v52 }
  0x7e   : > { %710 = vmatpush1.msra.mxu0 %v683_v38  ;;  %1171 = vmatprep.subr.mxu1 %v1455_v0  ;;  %v346_v38 = vsub.s32 1, %v341_v35 }
  0x7f   : > { %427 = vmatmul.mubr.f32.gmra.mxu0 %v1649_v39  ;;  %711 = vmatprep.subr.mxu0 %v1455_v0 }
  0x80   : > { %432 = vmatprep.mubr.f32.mxu0 %v1455_v0  ;;  %712 = vmatpush1.msra.mxu0 %v682_v40  ;;  %v1862_v40 = vrot.slane %v338_v37, %v342_v36 }
  0x81   : > { %713 = vmatprep.subr.mxu0 %v1455_v0  ;;  %1203 = vmatpush1.msra.mxu1 %v673_v53 }
  0x82   : > { %714 = vmatpush1.msra.mxu0 %v681_v41  ;;  %1172 = vmatprep.subr.mxu1 %v1455_v0  ;;  %v1864_v41 = vrot.slane %v338_v37, %v346_v38 }
  0x83   : > { %433 = vmatmul.mubr.f32.gmra.mxu0 %v1657_v42  ;;  %715 = vmatprep.subr.mxu0 %v1455_v0 }
  0x84   : > { %438 = vmatprep.mubr.f32.mxu0 %v1455_v0  ;;  %716 = vmatpush1.msra.mxu0 %v680_v43 }
  0x85   : > { %717 = vmatprep.subr.mxu0 %v1455_v0  ;;  %1204 = vmatpush1.msra.mxu1 %v672_v55 }
  0x86   : > { %718 = vmatpush1.msra.mxu0 %v679_v44  ;;  %1173 = vmatprep.subr.mxu1 %v1455_v0 }
  0x87   : > { %439 = vmatmul.mubr.f32.gmra.mxu0 %v1665_v45  ;;  %719 = vmatprep.subr.mxu0 %v1455_v0 }
  0x88   : > { %444 = vmatprep.mubr.f32.mxu0 %v1455_v0  ;;  %720 = vmatpush1.msra.mxu0 %v678_v46 }
  0x89   : > { %721 = vmatprep.subr.mxu0 %v1455_v0  ;;  %1205 = vmatpush1.msra.mxu1 %v671_v56 }
  0x8a   : > { %722 = vmatpush1.msra.mxu0 %v677_v47  ;;  %1174 = vmatprep.subr.mxu1 %v1455_v0 }
  0x8b   : > { %445 = vmatmul.mubr.f32.gmra.mxu0 %v1673_v48  ;;  %723 = vmatprep.subr.mxu0 %v1455_v0 }
  0x8c   : > { %450 = vmatprep.mubr.f32.mxu0 %v1455_v0  ;;  %724 = vmatpush1.msra.mxu0 %v676_v49 }
  0x8d   : > { %725 = vmatprep.subr.mxu0 %v1455_v0  ;;  %1206 = vmatpush2.msra.mxu1 %v702_v58 }
  0x8e   : > { %726 = vmatpush1.msra.mxu0 %v675_v50  ;;  %1175 = vmatprep.subr.mxu1 %v1455_v0 }
  0x8f   : > { %451 = vmatmul.mubr.f32.gmra.mxu0 %v1681_v51  ;;  %727 = vmatprep.subr.mxu0 %v1455_v0 }
  0x90   : > { %456 = vmatprep.mubr.f32.mxu0 %v1455_v0  ;;  %728 = vmatpush1.msra.mxu0 %v674_v52 }
  0x91   : > { %729 = vmatprep.subr.mxu0 %v1455_v0  ;;  %1207 = vmatpush2.msra.mxu1 %v701_v59 }
  0x92   : > { %730 = vmatpush1.msra.mxu0 %v673_v53  ;;  %1176 = vmatprep.subr.mxu1 %v1455_v0 }
  0x93   : > { %457 = vmatmul.mubr.f32.gmra.mxu0 %v1689_v54  ;;  %731 = vmatprep.subr.mxu0 %v1455_v0 }
  0x94   : > { %462 = vmatprep.mubr.f32.mxu0 %v1455_v0  ;;  %732 = vmatpush1.msra.mxu0 %v672_v55 }
  0x95   : > { %733 = vmatprep.subr.mxu0 %v1455_v0  ;;  %1208 = vmatpush2.msra.mxu1 %v700_v61 }
  0x96   : > { %734 = vmatpush1.msra.mxu0 %v671_v56  ;;  %1177 = vmatprep.subr.mxu1 %v1455_v0 }
  0x97   : > { %463 = vmatmul.mubr.f32.gmra.mxu0 %v1697_v57  ;;  %735 = vmatprep.subr.mxu0 %v1455_v0 }
  0x98   : > { %468 = vmatprep.mubr.f32.mxu0 %v1455_v0  ;;  %736 = vmatpush2.msra.mxu0 %v702_v58 }
  0x99   : > { %737 = vmatprep.subr.mxu0 %v1455_v0  ;;  %1209 = vmatpush2.msra.mxu1 %v699_v62 }
  0x9a   : > { %738 = vmatpush2.msra.mxu0 %v701_v59  ;;  %1178 = vmatprep.subr.mxu1 %v1455_v0 }
  0x9b   : > { %469 = vmatmul.mubr.f32.gmra.mxu0 %v1705_v60  ;;  %739 = vmatprep.subr.mxu0 %v1455_v0 }
  0x9c   : > { %474 = vmatprep.mubr.f32.mxu0 %v1455_v0  ;;  %740 = vmatpush2.msra.mxu0 %v700_v61 }
  0x9d   : > { %741 = vmatprep.subr.mxu0 %v1455_v0  ;;  %1210 = vmatpush2.msra.mxu1 %v698_v1 }
  0x9e   : > { %742 = vmatpush2.msra.mxu0 %v699_v62  ;;  %1179 = vmatprep.subr.mxu1 %v1455_v0 }
  0x9f   : > { %475 = vmatmul.mubr.f32.gmra.mxu0 %v1713_v63  ;;  %743 = vmatprep.subr.mxu0 %v1455_v0 }
  0xa0   : > { %480 = vmatprep.mubr.f32.mxu0 %v1455_v0  ;;  %744 = vmatpush2.msra.mxu0 %v698_v1 }
  0xa1   : > { %745 = vmatprep.subr.mxu0 %v1455_v0  ;;  %1211 = vmatpush2.msra.mxu1 %v697_v3 }
  0xa2   : > { %746 = vmatpush2.msra.mxu0 %v697_v3  ;;  %1180 = vmatprep.subr.mxu1 %v1455_v0 }
  0xa3   : > { %481 = vmatmul.mubr.f32.gmra.mxu0 %v1721_v2  ;;  %747 = vmatprep.subr.mxu0 %v1455_v0 }
  0xa4   : > { %486 = vmatprep.mubr.f32.mxu0 %v1455_v0  ;;  %748 = vmatpush2.msra.mxu0 %v1727_v4 }
  0xa5   : > { %749 = vmatprep.subr.mxu0 %v1455_v0  ;;  %1212 = vmatpush2.msra.mxu1 %v1727_v4 }
  0xa6   : > { %750 = vmatpush2.msra.mxu0 %v695_v6  ;;  %1181 = vmatprep.subr.mxu1 %v1455_v0 }
  0xa7   : > { %487 = vmatmul.mubr.f32.gmra.mxu0 %v1731_v5  ;;  %751 = vmatprep.subr.mxu0 %v1455_v0 }
  0xa8   : > { %492 = vmatprep.mubr.f32.mxu0 %v1455_v0  ;;  %752 = vmatpush2.msra.mxu0 %v694_v8 }
  0xa9   : > { %753 = vmatprep.subr.mxu0 %v1455_v0  ;;  %1213 = vmatpush2.msra.mxu1 %v695_v6 }
  0xaa   : > { %754 = vmatpush2.msra.mxu0 %v693_v9  ;;  %1182 = vmatprep.subr.mxu1 %v1455_v0 }
  0xab   : > { %493 = vmatmul.mubr.f32.gmra.mxu0 %v1740_v7  ;;  %755 = vmatprep.subr.mxu0 %v1455_v0 }
  0xac   : > { %498 = vmatprep.mubr.f32.mxu0 %v1455_v0  ;;  %756 = vmatpush2.msra.mxu0 %v692_v11 }
  0xad   : > { %757 = vmatprep.subr.mxu0 %v1455_v0  ;;  %1214 = vmatpush2.msra.mxu1 %v694_v8 }
  0xae   : > { %758 = vmatpush2.msra.mxu0 %v691_v13  ;;  %1183 = vmatprep.subr.mxu1 %v1455_v0 }
  0xaf   : > { %499 = vmatmul.mubr.f32.gmra.mxu0 %v1748_v10  ;;  %759 = vmatprep.subr.mxu0 %v1455_v0 }
  0xb0   : > { %504 = vmatprep.mubr.f32.mxu0 %v1455_v0  ;;  %760 = vmatpush2.msra.mxu0 %v690_v15 }
  0xb1   : > { %761 = vmatprep.subr.mxu0 %v1455_v0  ;;  %1215 = vmatpush2.msra.mxu1 %v693_v9 }
  0xb2   : > { %762 = vmatpush2.msra.mxu0 %v689_v17  ;;  %1184 = vmatprep.subr.mxu1 %v1455_v0 }
  0xb3   : > { %505 = vmatmul.mubr.f32.gmra.mxu0 %v1756_v12  ;;  %763 = vmatprep.subr.mxu0 %v1455_v0 }
  0xb4   : > { %510 = vmatprep.mubr.f32.mxu0 %v1455_v0  ;;  %764 = vmatpush2.msra.mxu0 %v688_v18 }
  0xb5   : > { %765 = vmatprep.subr.mxu0 %v1455_v0  ;;  %1216 = vmatpush2.msra.mxu1 %v692_v11 }
  0xb6   : > { %766 = vmatpush2.msra.mxu0 %v687_v20  ;;  %1185 = vmatprep.subr.mxu1 %v1455_v0 }
  0xb7   : > { %511 = vmatmul.mubr.f32.gmra.mxu0 %v1764_v14  ;;  %1217 = vmatpush2.msra.mxu1 %v691_v13 }
  0xb8   : > { %516 = vmatprep.mubr.f32.mxu0 %v1455_v0  ;;  %1186 = vmatprep.subr.mxu1 %v1455_v0 }
  0xb9   : > { %1218 = vmatpush2.msra.mxu1 %v690_v15 }
  0xba   : > { %1187 = vmatprep.subr.mxu1 %v1455_v0 }
  0xbb   : > { %517 = vmatmul.mubr.f32.gmra.mxu0 %v1772_v16  ;;  %1219 = vmatpush2.msra.mxu1 %v689_v17 }
  0xbc   : > { %522 = vmatprep.mubr.f32.mxu0 %v1455_v0  ;;  %1188 = vmatprep.subr.mxu1 %v1455_v0 }
  0xbd   : > { %1220 = vmatpush2.msra.mxu1 %v688_v18 }
  0xbe   : > { %1189 = vmatprep.subr.mxu1 %v1455_v0 }
  0xbf   : > { %523 = vmatmul.mubr.f32.gmra.mxu0 %v1780_v19  ;;  %1221 = vmatpush2.msra.mxu1 %v687_v20 }
  0xc0   : > { %528 = vmatprep.mubr.f32.mxu0 %v1455_v0 }
  0xc3   : > { %529 = vmatmul.mubr.f32.gmra.mxu0 %v1789_v21 }
  0xc4   : > { %534 = vmatprep.mubr.f32.mxu0 %v1455_v0 }
  0xc7   : > { %535 = vmatmul.mubr.f32.gmra.mxu0 %v1795_v22 }
  0xc8   : > { %540 = vmatprep.mubr.f32.mxu0 %v1455_v0 }
  0xcb   : > { %541 = vmatmul.mubr.f32.gmra.mxu0 %v1802_v23 }
  0xcc   : > { %546 = vmatprep.mubr.f32.mxu0 %v1455_v0 }
  0xcf   : > { %547 = vmatmul.mubr.f32.gmra.mxu0 %v1809_v24 }
  0xd0   : > { %552 = vmatprep.mubr.f32.mxu0 %v1455_v0 }
  0xd3   : > { %553 = vmatmul.mubr.f32.gmra.mxu0 %v1816_v25 }
  0xd4   : > { %558 = vmatprep.mubr.f32.mxu0 %v1455_v0 }
  0xd7   : > { %559 = vmatmul.mubr.f32.gmra.mxu0 %v1821_v26 }
  0xd8   : > { %564 = vmatprep.mubr.f32.mxu0 %v1455_v0 }
  0xdb   : > { %565 = vmatmul.mubr.f32.gmra.mxu0 %v1826_v27 }
  0xdc   : > { %570 = vmatprep.mubr.f32.mxu0 %v1455_v0 }
  0xdf   : > { %571 = vmatmul.mubr.f32.gmra.mxu0 %v1831_v28 }
  0xe0   : > { %576 = vmatprep.mubr.f32.mxu0 %v1455_v0 }
  0xe3   : > { %577 = vmatmul.mubr.f32.gmra.mxu0 %v1836_v29 }
  0xe4   : > { %582 = vmatprep.mubr.f32.mxu0 %v1455_v0 }
  0xe7   : > { %583 = vmatmul.mubr.f32.gmra.mxu0 %v1841_v30 }
  0xe8   : > { %588 = vmatprep.mubr.f32.mxu0 %v1455_v0 }
  0xeb   : > { %589 = vmatmul.mubr.f32.gmra.mxu0 %v1846_v31 }
  0xec   : > { %594 = vmatprep.mubr.f32.mxu0 %v1455_v0 }
  0xef   : > { %595 = vmatmul.mubr.f32.gmra.mxu0 %v1851_v32 }
  0xf0   : > { %600 = vmatprep.mubr.f32.mxu0 %v1455_v0 }
  0xf3   : > { %601 = vmatmul.mubr.f32.gmra.mxu0 %v1856_v33 }
 0x137   : > { %v416_v43 = vpop.f32.mrf.mxu0 }
 0x138   : > { %v417_v44 = vadd.f32 %v416_v43, %v1862_v40 }
 0x139   : > { %v418_v0 = vpop.f32.mrf.mxu0 }
 0x13a   : > { %v419_v46 = vadd.f32 %v418_v0, %v1864_v41  ;;  %v607_v50 = vmax.f32 %v417_v44, 0.0 }
 0x13b   : > { %v422_v47 = vpop.f32.mrf.mxu0 }
 0x13c   : > { %v608_v49 = vmax.f32 %v419_v46, 0.0  ;;  %v423_v52 = vadd.f32 %v422_v47, %v1862_v40 }
 0x13d   : > { %v424_v53 = vpop.f32.mrf.mxu0 }
 0x13e   : > { %v425_v55 = vadd.f32 %v424_v53, %v1864_v41  ;;  %767 = vmatprep.mubr.f32.mxu0 %v608_v49  ;;  %v609_v59 = vmax.f32 %v423_v52, 0.0 }
 0x13f   : > { %v428_v56 = vpop.f32.mrf.mxu0  ;;  %768 = vmatmul.mubr.f32.vlgmr.msra.gmra.mxu0 %v607_v50 }
 0x140   : > { %v610_v58 = vmax.f32 %v425_v55, 0.0  ;;  %v429_v61 = vadd.f32 %v428_v56, %v1862_v40 }
 0x141   : > { %v430_v62 = vpop.f32.mrf.mxu0 }
 0x142   : > { %v431_v1 = vadd.f32 %v430_v62, %v1864_v41  ;;  %772 = vmatprep.mubr.f32.mxu0 %v610_v58  ;;  %v611_v6 = vmax.f32 %v429_v61, 0.0 }
 0x143   : > { %v434_v3 = vpop.f32.mrf.mxu0  ;;  %773 = vmatmul.mubr.f32.gmra.mxu0 %v609_v59 }
 0x144   : > { %v612_v4 = vmax.f32 %v431_v1, 0.0  ;;  %v435_v8 = vadd.f32 %v434_v3, %v1862_v40 }
 0x145   : > { %v436_v9 = vpop.f32.mrf.mxu0 }
 0x146   : > { %v437_v11 = vadd.f32 %v436_v9, %v1864_v41  ;;  %777 = vmatprep.mubr.f32.mxu0 %v612_v4  ;;  %v613_v17 = vmax.f32 %v435_v8, 0.0 }
 0x147   : > { %v440_v13 = vpop.f32.mrf.mxu0  ;;  %778 = vmatmul.mubr.f32.gmra.mxu0 %v611_v6 }
 0x148   : > { %v614_v15 = vmax.f32 %v437_v11, 0.0  ;;  %v441_v18 = vadd.f32 %v440_v13, %v1862_v40 }
 0x149   : > { %v442_v20 = vpop.f32.mrf.mxu0 }
 0x14a   : > { %782 = vmatprep.mubr.f32.mxu0 %v614_v15  ;;  %v443_v34 = vadd.f32 %v442_v20, %v1864_v41  ;;  %v615_v37 = vmax.f32 %v441_v18, 0.0 }
 0x14b   : > { %v446_v35 = vpop.f32.mrf.mxu0  ;;  %783 = vmatmul.mubr.f32.gmra.mxu0 %v613_v17 }
 0x14c   : > { %v616_v36 = vmax.f32 %v443_v34, 0.0  ;;  %v447_v38 = vadd.f32 %v446_v35, %v1862_v40 }
 0x14d   : > { %v448_v43 = vpop.f32.mrf.mxu0 }
 0x14e   : > { %v449_v44 = vadd.f32 %v448_v43, %v1864_v41  ;;  %787 = vmatprep.mubr.f32.mxu1 %v616_v36  ;;  %v617_v47 = vmax.f32 %v447_v38, 0.0 }
 0x14f   : > { %v452_v0 = vpop.f32.mrf.mxu0  ;;  %788 = vmatmul.mubr.f32.vlgmr.msra.gmra.mxu1 %v615_v37 }
 0x150   : > { %v618_v46 = vmax.f32 %v449_v44, 0.0  ;;  %v453_v49 = vadd.f32 %v452_v0, %v1862_v40 }
 0x151   : > { %v454_v50 = vpop.f32.mrf.mxu0 }
 0x152   : > { %v455_v52 = vadd.f32 %v454_v50, %v1864_v41  ;;  %792 = vmatprep.mubr.f32.mxu1 %v618_v46  ;;  %v619_v56 = vmax.f32 %v453_v49, 0.0 }
 0x153   : > { %v458_v53 = vpop.f32.mrf.mxu0  ;;  %793 = vmatmul.mubr.f32.gmra.mxu1 %v617_v47 }
 0x154   : > { %v620_v55 = vmax.f32 %v455_v52, 0.0  ;;  %v459_v58 = vadd.f32 %v458_v53, %v1862_v40 }
 0x155   : > { %v460_v59 = vpop.f32.mrf.mxu0 }
 0x156   : > { %v461_v61 = vadd.f32 %v460_v59, %v1864_v41  ;;  %797 = vmatprep.mubr.f32.mxu1 %v620_v55  ;;  %v621_v3 = vmax.f32 %v459_v58, 0.0 }
 0x157   : > { %v464_v62 = vpop.f32.mrf.mxu0  ;;  %798 = vmatmul.mubr.f32.gmra.mxu1 %v619_v56 }
 0x158   : > { %v622_v1 = vmax.f32 %v461_v61, 0.0  ;;  %v465_v4 = vadd.f32 %v464_v62, %v1862_v40 }
 0x159   : > { %v466_v6 = vpop.f32.mrf.mxu0 }
 0x15a   : > { %v467_v8 = vadd.f32 %v466_v6, %v1864_v41  ;;  %802 = vmatprep.mubr.f32.mxu1 %v622_v1  ;;  %v623_v13 = vmax.f32 %v465_v4, 0.0 }
 0x15b   : > { %v470_v9 = vpop.f32.mrf.mxu0  ;;  %803 = vmatmul.mubr.f32.gmra.mxu1 %v621_v3 }
 0x15c   : > { %v624_v11 = vmax.f32 %v467_v8, 0.0  ;;  %v471_v15 = vadd.f32 %v470_v9, %v1862_v40 }
 0x15d   : > { %v472_v17 = vpop.f32.mrf.mxu0 }
 0x15e   : > { %v473_v18 = vadd.f32 %v472_v17, %v1864_v41  ;;  %807 = vmatprep.mubr.f32.mxu1 %v624_v11  ;;  %v625_v35 = vmax.f32 %v471_v15, 0.0 }
 0x15f   : > { %v476_v20 = vpop.f32.mrf.mxu0  ;;  %808 = vmatmul.mubr.f32.gmra.mxu1 %v623_v13 }
 0x160   : > { %v626_v34 = vmax.f32 %v473_v18, 0.0  ;;  %v477_v36 = vadd.f32 %v476_v20, %v1862_v40 }
 0x161   : > { %v478_v37 = vpop.f32.mrf.mxu0 }
 0x162   : > { %v479_v38 = vadd.f32 %v478_v37, %v1864_v41  ;;  %812 = vmatprep.mubr.f32.mxu1 %v626_v34  ;;  %v627_v0 = vmax.f32 %v477_v36, 0.0 }
 0x163   : > { %v482_v43 = vpop.f32.mrf.mxu0  ;;  %813 = vmatmul.mubr.f32.gmra.mxu1 %v625_v35 }
 0x164   : > { %v628_v44 = vmax.f32 %v479_v38, 0.0  ;;  %v483_v46 = vadd.f32 %v482_v43, %v1862_v40 }
 0x165   : > { %v484_v47 = vpop.f32.mrf.mxu0 }
 0x166   : > { %v485_v49 = vadd.f32 %v484_v47, %v1864_v41  ;;  %817 = vmatprep.mubr.f32.mxu1 %v628_v44  ;;  %v629_v53 = vmax.f32 %v483_v46, 0.0 }
 0x167   : > { %v488_v50 = vpop.f32.mrf.mxu0  ;;  %818 = vmatmul.mubr.f32.gmra.mxu1 %v627_v0 }
 0x168   : > { %v630_v52 = vmax.f32 %v485_v49, 0.0  ;;  %v489_v55 = vadd.f32 %v488_v50, %v1862_v40 }
 0x169   : > { %v490_v56 = vpop.f32.mrf.mxu0 }
 0x16a   : > { %v491_v58 = vadd.f32 %v490_v56, %v1864_v41  ;;  %822 = vmatprep.mubr.f32.mxu1 %v630_v52  ;;  %v631_v62 = vmax.f32 %v489_v55, 0.0 }
 0x16b   : > { %v494_v59 = vpop.f32.mrf.mxu0  ;;  %823 = vmatmul.mubr.f32.gmra.mxu1 %v629_v53 }
 0x16c   : > { %v632_v61 = vmax.f32 %v491_v58, 0.0  ;;  %v495_v1 = vadd.f32 %v494_v59, %v1862_v40 }
 0x16d   : > { %v496_v3 = vpop.f32.mrf.mxu0 }
 0x16e   : > { %v497_v4 = vadd.f32 %v496_v3, %v1864_v41  ;;  %827 = vmatprep.mubr.f32.mxu1 %v632_v61  ;;  %v633_v9 = vmax.f32 %v495_v1, 0.0 }
 0x16f   : > { %v500_v6 = vpop.f32.mrf.mxu0  ;;  %828 = vmatmul.mubr.f32.gmra.mxu1 %v631_v62 }
 0x170   : > { %v634_v8 = vmax.f32 %v497_v4, 0.0  ;;  %v501_v11 = vadd.f32 %v500_v6, %v1862_v40 }
 0x171   : > { %v502_v13 = vpop.f32.mrf.mxu0 }
 0x172   : > { %v503_v15 = vadd.f32 %v502_v13, %v1864_v41  ;;  %832 = vmatprep.mubr.f32.mxu1 %v634_v8  ;;  %v635_v20 = vmax.f32 %v501_v11, 0.0 }
 0x173   : > { %v506_v17 = vpop.f32.mrf.mxu0  ;;  %833 = vmatmul.mubr.f32.gmra.mxu1 %v633_v9 }
 0x174   : > { %v636_v18 = vmax.f32 %v503_v15, 0.0  ;;  %v507_v34 = vadd.f32 %v506_v17, %v1862_v40 }
 0x175   : > { %v508_v35 = vpop.f32.mrf.mxu0 }
 0x176   : > { %v509_v36 = vadd.f32 %v508_v35, %v1864_v41  ;;  %837 = vmatprep.mubr.f32.mxu1 %v636_v18  ;;  %v637_v43 = vmax.f32 %v507_v34, 0.0 }
 0x177   : > { %v512_v37 = vpop.f32.mrf.mxu0  ;;  %838 = vmatmul.mubr.f32.gmra.mxu1 %v635_v20 }
 0x178   : > { %v638_v38 = vmax.f32 %v509_v36, 0.0  ;;  %v513_v44 = vadd.f32 %v512_v37, %v1862_v40 }
 0x179   : > { %v514_v0 = vpop.f32.mrf.mxu0 }
 0x17a   : > { %v515_v46 = vadd.f32 %v514_v0, %v1864_v41  ;;  %842 = vmatprep.mubr.f32.mxu1 %v638_v38  ;;  %v639_v50 = vmax.f32 %v513_v44, 0.0 }
 0x17b   : > { %v518_v47 = vpop.f32.mrf.mxu0  ;;  %843 = vmatmul.mubr.f32.gmra.mxu1 %v637_v43 }
 0x17c   : > { %v640_v49 = vmax.f32 %v515_v46, 0.0  ;;  %v519_v52 = vadd.f32 %v518_v47, %v1862_v40 }
 0x17d   : > { %v520_v53 = vpop.f32.mrf.mxu0 }
 0x17e   : > { %v521_v55 = vadd.f32 %v520_v53, %v1864_v41  ;;  %847 = vmatprep.mubr.f32.mxu1 %v640_v49  ;;  %v641_v59 = vmax.f32 %v519_v52, 0.0 }
 0x17f   : > { %v524_v56 = vpop.f32.mrf.mxu0  ;;  %848 = vmatmul.mubr.f32.gmra.mxu1 %v639_v50 }
 0x180   : > { %v642_v58 = vmax.f32 %v521_v55, 0.0  ;;  %v525_v61 = vadd.f32 %v524_v56, %v1862_v40 }
 0x181   : > { %v526_v62 = vpop.f32.mrf.mxu0 }
 0x182   : > { %v527_v1 = vadd.f32 %v526_v62, %v1864_v41  ;;  %852 = vmatprep.mubr.f32.mxu1 %v642_v58  ;;  %v643_v6 = vmax.f32 %v525_v61, 0.0 }
 0x183   : > { %v530_v3 = vpop.f32.mrf.mxu0  ;;  %853 = vmatmul.mubr.f32.gmra.mxu1 %v641_v59 }
 0x184   : > { %v644_v4 = vmax.f32 %v527_v1, 0.0  ;;  %v531_v8 = vadd.f32 %v530_v3, %v1862_v40 }
 0x185   : > { %v532_v9 = vpop.f32.mrf.mxu0 }
 0x186   : > { %v533_v11 = vadd.f32 %v532_v9, %v1864_v41  ;;  %857 = vmatprep.mubr.f32.mxu1 %v644_v4  ;;  %v645_v17 = vmax.f32 %v531_v8, 0.0 }
 0x187   : > { %v536_v13 = vpop.f32.mrf.mxu0  ;;  %858 = vmatmul.mubr.f32.gmra.mxu1 %v643_v6 }
 0x188   : > { %v646_v15 = vmax.f32 %v533_v11, 0.0  ;;  %v537_v18 = vadd.f32 %v536_v13, %v1862_v40 }
 0x189   : > { %v538_v20 = vpop.f32.mrf.mxu0 }
 0x18a   : > { %v539_v34 = vadd.f32 %v538_v20, %v1864_v41  ;;  %862 = vmatprep.mubr.f32.mxu1 %v646_v15  ;;  %v647_v37 = vmax.f32 %v537_v18, 0.0 }
 0x18b   : > { %v542_v35 = vpop.f32.mrf.mxu0  ;;  %863 = vmatmul.mubr.f32.gmra.mxu1 %v645_v17 }
 0x18c   : > { %v648_v36 = vmax.f32 %v539_v34, 0.0  ;;  %v543_v38 = vadd.f32 %v542_v35, %v1862_v40 }
 0x18d   : > { %v544_v43 = vpop.f32.mrf.mxu0 }
 0x18e   : > { %v545_v44 = vadd.f32 %v544_v43, %v1864_v41  ;;  %867 = vmatprep.mubr.f32.mxu1 %v648_v36  ;;  %v649_v47 = vmax.f32 %v543_v38, 0.0 }
 0x18f   : > { %v548_v0 = vpop.f32.mrf.mxu0  ;;  %868 = vmatmul.mubr.f32.gmra.mxu1 %v647_v37 }
 0x190   : > { %v650_v46 = vmax.f32 %v545_v44, 0.0  ;;  %v549_v49 = vadd.f32 %v548_v0, %v1862_v40 }
 0x191   : > { %v550_v50 = vpop.f32.mrf.mxu0 }
 0x192   : > { %v551_v52 = vadd.f32 %v550_v50, %v1864_v41  ;;  %872 = vmatprep.mubr.f32.mxu1 %v650_v46  ;;  %v651_v56 = vmax.f32 %v549_v49, 0.0 }
 0x193   : > { %v554_v53 = vpop.f32.mrf.mxu0  ;;  %873 = vmatmul.mubr.f32.gmra.mxu1 %v649_v47 }
 0x194   : > { %v652_v55 = vmax.f32 %v551_v52, 0.0  ;;  %v555_v58 = vadd.f32 %v554_v53, %v1862_v40 }
 0x195   : > { %v556_v59 = vpop.f32.mrf.mxu0 }
 0x196   : > { %v557_v61 = vadd.f32 %v556_v59, %v1864_v41  ;;  %877 = vmatprep.mubr.f32.mxu1 %v652_v55  ;;  %v653_v3 = vmax.f32 %v555_v58, 0.0 }
 0x197   : > { %v560_v62 = vpop.f32.mrf.mxu0  ;;  %878 = vmatmul.mubr.f32.gmra.mxu1 %v651_v56 }
 0x198   : > { %v654_v1 = vmax.f32 %v557_v61, 0.0  ;;  %v561_v4 = vadd.f32 %v560_v62, %v1862_v40 }
 0x199   : > { %v562_v6 = vpop.f32.mrf.mxu0 }
 0x19a   : > { %v563_v8 = vadd.f32 %v562_v6, %v1864_v41  ;;  %882 = vmatprep.mubr.f32.mxu1 %v654_v1  ;;  %v655_v13 = vmax.f32 %v561_v4, 0.0 }
 0x19b   : > { %v566_v9 = vpop.f32.mrf.mxu0  ;;  %883 = vmatmul.mubr.f32.gmra.mxu1 %v653_v3 }
 0x19c   : > { %v656_v11 = vmax.f32 %v563_v8, 0.0  ;;  %v567_v15 = vadd.f32 %v566_v9, %v1862_v40 }
 0x19d   : > { %v568_v17 = vpop.f32.mrf.mxu0 }
 0x19e   : > { %v569_v18 = vadd.f32 %v568_v17, %v1864_v41  ;;  %887 = vmatprep.mubr.f32.mxu1 %v656_v11  ;;  %v657_v35 = vmax.f32 %v567_v15, 0.0 }
 0x19f   : > { %v572_v20 = vpop.f32.mrf.mxu0  ;;  %888 = vmatmul.mubr.f32.gmra.mxu1 %v655_v13 }
 0x1a0   : > { %v658_v34 = vmax.f32 %v569_v18, 0.0  ;;  %v573_v36 = vadd.f32 %v572_v20, %v1862_v40 }
 0x1a1   : > { %v574_v37 = vpop.f32.mrf.mxu0 }
 0x1a2   : > { %v575_v38 = vadd.f32 %v574_v37, %v1864_v41  ;;  %892 = vmatprep.mubr.f32.mxu1 %v658_v34  ;;  %v659_v0 = vmax.f32 %v573_v36, 0.0 }
 0x1a3   : > { %v578_v43 = vpop.f32.mrf.mxu0  ;;  %893 = vmatmul.mubr.f32.gmra.mxu1 %v657_v35 }
 0x1a4   : > { %v660_v44 = vmax.f32 %v575_v38, 0.0  ;;  %v579_v46 = vadd.f32 %v578_v43, %v1862_v40 }
 0x1a5   : > { %v580_v47 = vpop.f32.mrf.mxu0 }
 0x1a6   : > { %v581_v49 = vadd.f32 %v580_v47, %v1864_v41  ;;  %897 = vmatprep.mubr.f32.mxu1 %v660_v44  ;;  %v661_v53 = vmax.f32 %v579_v46, 0.0  ;;  %v1933_v44 = vld [vmem:[%s2088_s4] ss:$0 sm:$0xff] }
 0x1a7   : > { %v584_v50 = vpop.f32.mrf.mxu0  ;;  %898 = vmatmul.mubr.f32.gmra.mxu1 %v659_v0  ;;  %v1296_v0 = vld [vmem:[%s1627_s15] sm:$0xff] }
 0x1a8   : > { %v662_v52 = vmax.f32 %v581_v49, 0.0  ;;  %v585_v55 = vadd.f32 %v584_v50, %v1862_v40 }
 0x1a9   : > { %v586_v56 = vpop.f32.mrf.mxu0 }
 0x1aa   : > { %v587_v58 = vadd.f32 %v586_v56, %v1864_v41  ;;  %902 = vmatprep.mubr.f32.mxu1 %v662_v52  ;;  %v663_v62 = vmax.f32 %v585_v55, 0.0 }
 0x1ab   : > { %v590_v59 = vpop.f32.mrf.mxu0  ;;  %903 = vmatmul.mubr.f32.gmra.mxu1 %v661_v53 }
 0x1ac   : > { %v664_v61 = vmax.f32 %v587_v58, 0.0  ;;  %v591_v1 = vadd.f32 %v590_v59, %v1862_v40 }
 0x1ad   : > { %v592_v3 = vpop.f32.mrf.mxu0 }
 0x1ae   : > { %v593_v4 = vadd.f32 %v592_v3, %v1864_v41  ;;  %907 = vmatprep.mubr.f32.mxu1 %v664_v61  ;;  %v665_v9 = vmax.f32 %v591_v1, 0.0 }
 0x1af   : > { %v596_v6 = vpop.f32.mrf.mxu0  ;;  %908 = vmatmul.mubr.f32.gmra.mxu1 %v663_v62 }
 0x1b0   : > { %v666_v8 = vmax.f32 %v593_v4, 0.0  ;;  %v597_v11 = vadd.f32 %v596_v6, %v1862_v40 }
 0x1b1   : > { %v598_v13 = vpop.f32.mrf.mxu0 }
 0x1b2   : > { %v599_v15 = vadd.f32 %v598_v13, %v1864_v41  ;;  %912 = vmatprep.mubr.f32.mxu1 %v666_v8  ;;  %v667_v20 = vmax.f32 %v597_v11, 0.0 }
 0x1b3   : > { %v602_v17 = vpop.f32.mrf.mxu0  ;;  %913 = vmatmul.mubr.f32.gmra.mxu1 %v665_v9 }
 0x1b4   : > { %v668_v18 = vmax.f32 %v599_v15, 0.0  ;;  %v603_v34 = vadd.f32 %v602_v17, %v1862_v40 }
 0x1b5   : > { %v604_v35 = vpop.f32.mrf.mxu0 }
 0x1b6   : > { %v605_v36 = vadd.f32 %v604_v35, %v1864_v41  ;;  %917 = vmatprep.mubr.f32.mxu1 %v668_v18  ;;  %v669_v38 = vmax.f32 %v603_v34, 0.0  ;;  %v1297_v41 = vld [vmem:[%s1627_s15 + $0x8] sm:$0xff] }
 0x1b7   : > { %918 = vmatmul.mubr.f32.gmra.mxu1 %v667_v20 }
 0x1b8   : > { %v670_v37 = vmax.f32 %v605_v36, 0.0 }
 0x1ba   : > { %922 = vmatprep.mubr.f32.mxu1 %v670_v37 }
 0x1bb   : > { %923 = vmatmul.mubr.f32.gmra.mxu1 %v669_v38 }
 0x1ff   : > { %v769_v43 = vpop.f32.mrf.mxu0 }
 0x200   : > { %v928_v46 = vadd.f32 %v1296_v0, %v769_v43 }
 0x201   : > { %v771_v40 = vpop.f32.mrf.mxu0 }
 0x202   : > { %v967_v47 = vadd.f32 %v1933_v44, %v928_v46 }
 0x203   : > { %v774_v49 = vpop.f32.mrf.mxu0 }
 0x204   : > { %999 = vst [vmem:[%s1939_s12] sm:$0xff] %v967_v47  ;;  %v929_v50 = vadd.f32 %v1297_v41, %v774_v49 }
 0x205   : > { %v776_v52 = vpop.f32.mrf.mxu0 }
 0x206   : > { %v968_v53 = vadd.f32 %v1933_v44, %v929_v50 }
 0x207   : > { %v779_v55 = vpop.f32.mrf.mxu0 }
 0x208   : > { %1000 = vst [vmem:[%s1939_s12 + $0x8] sm:$0xff] %v968_v53  ;;  %v930_v56 = vadd.f32 %v779_v55, %v1649_v39 }
 0x209   : > { %v781_v58 = vpop.f32.mrf.mxu0 }
 0x20a   : > { %v969_v59 = vadd.f32 %v1933_v44, %v930_v56 }
 0x20b   : > { %v784_v61 = vpop.f32.mrf.mxu0 }
 0x20c   : > { %1001 = vst [vmem:[%s1939_s12 + $0x10] sm:$0xff] %v969_v59  ;;  %v931_v62 = vadd.f32 %v784_v61, %v1657_v42 }
 0x20d   : > { %v786_v1 = vpop.f32.mrf.mxu0 }
 0x20e   : > { %v970_v3 = vadd.f32 %v1933_v44, %v931_v62 }
 0x20f   : > { %v789_v4 = vpop.f32.mrf.mxu1 }
 0x210   : > { %1002 = vst [vmem:[%s1939_s12 + $0x18] sm:$0xff] %v970_v3  ;;  %v932_v6 = vadd.f32 %v789_v4, %v1665_v45 }
 0x211   : > { %v791_v8 = vpop.f32.mrf.mxu1 }
 0x212   : > { %v971_v9 = vadd.f32 %v1933_v44, %v932_v6 }
 0x213   : > { %v794_v39 = vpop.f32.mrf.mxu1 }
 0x214   : > { %1003 = vst [vmem:[%s1939_s12 + $0x20] sm:$0xff] %v971_v9  ;;  %v933_v11 = vadd.f32 %v794_v39, %v1673_v48 }
 0x215   : > { %v796_v13 = vpop.f32.mrf.mxu1 }
 0x216   : > { %v972_v15 = vadd.f32 %v1933_v44, %v933_v11 }
 0x217   : > { %v799_v42 = vpop.f32.mrf.mxu1 }
 0x218   : > { %1004 = vst [vmem:[%s1939_s12 + $0x28] sm:$0xff] %v972_v15  ;;  %v934_v17 = vadd.f32 %v799_v42, %v1681_v51 }
 0x219   : > { %v801_v18 = vpop.f32.mrf.mxu1 }
 0x21a   : > { %v973_v20 = vadd.f32 %v1933_v44, %v934_v17 }
 0x21b   : > { %v804_v45 = vpop.f32.mrf.mxu1 }
 0x21c   : > { %1005 = vst [vmem:[%s1939_s12 + $0x30] sm:$0xff] %v973_v20  ;;  %v935_v34 = vadd.f32 %v804_v45, %v1689_v54 }
 0x21d   : > { %v806_v35 = vpop.f32.mrf.mxu1 }
 0x21e   : > { %v974_v36 = vadd.f32 %v1933_v44, %v935_v34 }
 0x21f   : > { %v809_v48 = vpop.f32.mrf.mxu1 }
 0x220   : > { %1006 = vst [vmem:[%s1939_s12 + $0x38] sm:$0xff] %v974_v36  ;;  %v936_v37 = vadd.f32 %v809_v48, %v1697_v57 }
 0x221   : > { %v811_v38 = vpop.f32.mrf.mxu1 }
 0x222   : > { %v975_v43 = vadd.f32 %v1933_v44, %v936_v37 }
 0x223   : > { %v814_v51 = vpop.f32.mrf.mxu1 }
 0x224   : > { %1007 = vst [vmem:[%s1939_s12 + $0x40] sm:$0xff] %v975_v43  ;;  %v937_v0 = vadd.f32 %v814_v51, %v1705_v60 }
 0x225   : > { %v816_v46 = vpop.f32.mrf.mxu1 }
 0x226   : > { %v976_v40 = vadd.f32 %v1933_v44, %v937_v0 }
 0x227   : > { %v819_v54 = vpop.f32.mrf.mxu1 }
 0x228   : > { %1008 = vst [vmem:[%s1939_s12 + $0x48] sm:$0xff] %v976_v40  ;;  %v938_v47 = vadd.f32 %v819_v54, %v1713_v63 }
 0x229   : > { %v821_v49 = vpop.f32.mrf.mxu1 }
 0x22a   : > { %v977_v41 = vadd.f32 %v1933_v44, %v938_v47 }
 0x22b   : > { %v824_v57 = vpop.f32.mrf.mxu1 }
 0x22c   : > { %1009 = vst [vmem:[%s1939_s12 + $0x50] sm:$0xff] %v977_v41  ;;  %v939_v50 = vadd.f32 %v824_v57, %v1721_v2 }
 0x22d   : > { %v826_v52 = vpop.f32.mrf.mxu1 }
 0x22e   : > { %v978_v53 = vadd.f32 %v1933_v44, %v939_v50 }
 0x22f   : > { %v829_v60 = vpop.f32.mrf.mxu1 }
 0x230   : > { %1010 = vst [vmem:[%s1939_s12 + $0x58] sm:$0xff] %v978_v53  ;;  %v940_v55 = vadd.f32 %v829_v60, %v1731_v5 }
 0x231   : > { %v831_v56 = vpop.f32.mrf.mxu1 }
 0x232   : > { %v979_v58 = vadd.f32 %v1933_v44, %v940_v55 }
 0x233   : > { %v834_v63 = vpop.f32.mrf.mxu1 }
 0x234   : > { %1011 = vst [vmem:[%s1939_s12 + $0x60] sm:$0xff] %v979_v58  ;;  %v941_v59 = vadd.f32 %v834_v63, %v1740_v7 }
 0x235   : > { %v836_v61 = vpop.f32.mrf.mxu1 }
 0x236   : > { %v980_v62 = vadd.f32 %v1933_v44, %v941_v59 }
 0x237   : > { %v839_v2 = vpop.f32.mrf.mxu1 }
 0x238   : > { %1012 = vst [vmem:[%s1939_s12 + $0x68] sm:$0xff] %v980_v62  ;;  %v942_v1 = vadd.f32 %v839_v2, %v1748_v10 }
 0x239   : > { %v841_v3 = vpop.f32.mrf.mxu1 }
 0x23a   : > { %v981_v4 = vadd.f32 %v1933_v44, %v942_v1 }
 0x23b   : > { %v844_v5 = vpop.f32.mrf.mxu1 }
 0x23c   : > { %1013 = vst [vmem:[%s1939_s12 + $0x70] sm:$0xff] %v981_v4  ;;  %v943_v6 = vadd.f32 %v844_v5, %v1756_v12 }
 0x23d   : > { %v846_v8 = vpop.f32.mrf.mxu1 }
 0x23e   : > { %v982_v9 = vadd.f32 %v1933_v44, %v943_v6 }
 0x23f   : > { %v849_v7 = vpop.f32.mrf.mxu1 }
 0x240   : > { %1014 = vst [vmem:[%s1939_s12 + $0x78] sm:$0xff] %v982_v9  ;;  %v944_v39 = vadd.f32 %v849_v7, %v1764_v14 }
 0x241   : > { %v851_v11 = vpop.f32.mrf.mxu1 }
 0x242   : > { %v983_v13 = vadd.f32 %v1933_v44, %v944_v39 }
 0x243   : > { %v854_v10 = vpop.f32.mrf.mxu1 }
 0x244   : > { %1015 = vst [vmem:[%s1939_s12 + $0x80] sm:$0xff] %v983_v13  ;;  %v945_v15 = vadd.f32 %v854_v10, %v1772_v16 }
 0x245   : > { %v856_v42 = vpop.f32.mrf.mxu1 }
 0x246   : > { %v984_v17 = vadd.f32 %v1933_v44, %v945_v15 }
 0x247   : > { %v859_v12 = vpop.f32.mrf.mxu1 }
 0x248   : > { %1016 = vst [vmem:[%s1939_s12 + $0x88] sm:$0xff] %v984_v17  ;;  %v946_v18 = vadd.f32 %v859_v12, %v1780_v19 }
 0x249   : > { %v861_v20 = vpop.f32.mrf.mxu1 }
 0x24a   : > { %v985_v45 = vadd.f32 %v1933_v44, %v946_v18 }
 0x24b   : > { %v864_v14 = vpop.f32.mrf.mxu1 }
 0x24c   : > { %1017 = vst [vmem:[%s1939_s12 + $0x90] sm:$0xff] %v985_v45  ;;  %v947_v34 = vadd.f32 %v864_v14, %v1789_v21 }
 0x24d   : > { %v866_v35 = vpop.f32.mrf.mxu1 }
 0x24e   : > { %v986_v36 = vadd.f32 %v1933_v44, %v947_v34 }
 0x24f   : > { %v869_v16 = vpop.f32.mrf.mxu1 }
 0x250   : > { %1018 = vst [vmem:[%s1939_s12 + $0x98] sm:$0xff] %v986_v36  ;;  %v948_v48 = vadd.f32 %v869_v16, %v1795_v22 }
 0x251   : > { %v871_v37 = vpop.f32.mrf.mxu1 }
 0x252   : > { %v987_v38 = vadd.f32 %v1933_v44, %v948_v48 }
 0x253   : > { %v874_v19 = vpop.f32.mrf.mxu1 }
 0x254   : > { %1019 = vst [vmem:[%s1939_s12 + $0xa0] sm:$0xff] %v987_v38  ;;  %v949_v43 = vadd.f32 %v874_v19, %v1802_v23 }
 0x255   : > { %v876_v51 = vpop.f32.mrf.mxu1 }
 0x256   : > { %v988_v0 = vadd.f32 %v1933_v44, %v949_v43 }
 0x257   : > { %v879_v21 = vpop.f32.mrf.mxu1 }
 0x258   : > { %1020 = vst [vmem:[%s1939_s12 + $0xa8] sm:$0xff] %v988_v0  ;;  %v950_v46 = vadd.f32 %v879_v21, %v1809_v24 }
 0x259   : > { %v881_v40 = vpop.f32.mrf.mxu1 }
 0x25a   : > { %v989_v54 = vadd.f32 %v1933_v44, %v950_v46 }
 0x25b   : > { %v884_v22 = vpop.f32.mrf.mxu1 }
 0x25c   : > { %1021 = vst [vmem:[%s1939_s12 + $0xb0] sm:$0xff] %v989_v54  ;;  %v951_v47 = vadd.f32 %v884_v22, %v1816_v25 }
 0x25d   : > { %v886_v49 = vpop.f32.mrf.mxu1 }
 0x25e   : > { %v990_v41 = vadd.f32 %v1933_v44, %v951_v47 }
 0x25f   : > { %v889_v23 = vpop.f32.mrf.mxu1 }
 0x260   : > { %1022 = vst [vmem:[%s1939_s12 + $0xb8] sm:$0xff] %v990_v41  ;;  %v952_v57 = vadd.f32 %v889_v23, %v1821_v26 }
 0x261   : > { %v891_v50 = vpop.f32.mrf.mxu1 }
 0x262   : > { %v991_v52 = vadd.f32 %v1933_v44, %v952_v57 }
 0x263   : > { %v894_v24 = vpop.f32.mrf.mxu1 }
 0x264   : > { %1023 = vst [vmem:[%s1939_s12 + $0xc0] sm:$0xff] %v991_v52  ;;  %v953_v53 = vadd.f32 %v894_v24, %v1826_v27 }
 0x265   : > { %v896_v60 = vpop.f32.mrf.mxu1 }
 0x266   : > { %v992_v55 = vadd.f32 %v1933_v44, %v953_v53 }
 0x267   : > { %v899_v25 = vpop.f32.mrf.mxu1 }
 0x268   : > { %1024 = vst [vmem:[%s1939_s12 + $0xc8] sm:$0xff] %v992_v55  ;;  %v954_v56 = vadd.f32 %v899_v25, %v1831_v28 }
 0x269   : > { %v901_v58 = vpop.f32.mrf.mxu1 }
 0x26a   : > { %v993_v63 = vadd.f32 %v1933_v44, %v954_v56 }
 0x26b   : > { %v904_v26 = vpop.f32.mrf.mxu1 }
 0x26c   : > { %1025 = vst [vmem:[%s1939_s12 + $0xd0] sm:$0xff] %v993_v63  ;;  %v955_v59 = vadd.f32 %v904_v26, %v1836_v29 }
 0x26d   : > { %v906_v61 = vpop.f32.mrf.mxu1 }
 0x26e   : > { %v994_v62 = vadd.f32 %v1933_v44, %v955_v59 }
 0x26f   : > { %v909_v27 = vpop.f32.mrf.mxu1 }
 0x270   : > { %1026 = vst [vmem:[%s1939_s12 + $0xd8] sm:$0xff] %v994_v62  ;;  %v956_v2 = vadd.f32 %v909_v27, %v1841_v30 }
 0x271   : > { %v911_v1 = vpop.f32.mrf.mxu1 }
 0x272   : > { %v995_v28 = vadd.f32 %v1933_v44, %v956_v2 }
 0x273   : > { %v914_v3 = vpop.f32.mrf.mxu1 }
 0x274   : > { %1027 = vst [vmem:[%s1939_s12 + $0xe0] sm:$0xff] %v995_v28  ;;  %v957_v4 = vadd.f32 %v914_v3, %v1846_v31 }
 0x275   : > { %v916_v5 = vpop.f32.mrf.mxu1 }
 0x276   : > { %v996_v29 = vadd.f32 %v1933_v44, %v957_v4 }
 0x277   : > { %v919_v6 = vpop.f32.mrf.mxu1 }
 0x278   : > { %1028 = vst [vmem:[%s1939_s12 + $0xe8] sm:$0xff] %v996_v29  ;;  %v958_v8 = vadd.f32 %v919_v6, %v1851_v32 }
 0x279   : > { %v921_v9 = vpop.f32.mrf.mxu1 }
 0x27a   : > { %v997_v30 = vadd.f32 %v1933_v44, %v958_v8 }
 0x27b   : > { %v924_v7 = vpop.f32.mrf.mxu1 }
 0x27c   : > { %1029 = vst [vmem:[%s1939_s12 + $0xf0] sm:$0xff] %v997_v30  ;;  %v959_v39 = vadd.f32 %v924_v7, %v1856_v33 }
 0x27d   : > { %v926_v31 = vpop.f32.mrf.mxu1 }
 0x27e   : > { %v998_v32 = vadd.f32 %v1933_v44, %v959_v39 }
 0x280   : > { %1030 = vst [vmem:[%s1939_s12 + $0xf8] sm:$0xff] %v998_v32 }
 0x281   : > { %1391 = shalt.err (!%p1388_p9)
}
 0x282   : > { %s1392_s15 = scalar_lea.hbm %s2038_s11, 4096  ;;  %s1396_s14 = scalar_lea.hbm %s2089_s5, 16384 }
 0x283   : > { %p1393_p12 = scmp.ne.s32.totalorder %s2038_s11, %s1392_s15  ;;  %p1397_p4 = scmp.lt.s32.totalorder %s2038_s11, %s2089_s5 }
 0x284   : > { %p1398_p8 = scmp.lt.s32.totalorder %s1396_s14, %s1392_s15 }
 0x285   : > { %p1394_p3 = pnand %p1393_p12, %p2107_p0 }
 0x286   : > { %p1399_p7 = por %p1398_p8, %p1397_p4 }
 0x287   : > { %p1395_p13 = pneg %p1394_p3 }
 0x289   : > { %p1400_p10 = pnand %p1399_p7, %p1395_p13 }
 0x28b   : > { %1403 = shalt.err (!%p1400_p10)
}
 0x28c   : > { %s1457_s16 = smov 128   ;;  %s1458_s9 = smov 8  }
 0x28d   : > { %1232 = dma.vmem_to_hbm [thread:$0]  (%p2107_p0), %s2040_s8, 4096, %s2038_s11, %s1032_s22, %s1457_s16, %s1457_s16, %s1458_s9  }
 0x28e PF: > { %p1254_p1 = scmp.ge.s32.totalorder %s1446_s21, 2  ;;  %s1060_s30 = sand.u32 1, %s1434_s18  }
 0x28f   : > { %p2108_p2 = scmp.ne.s32.totalorder %s2096_s25, 0  ;;  %s1061_s27 = scalar_lea.sflag [#allocation4], %s1060_s30 }
 0x291   : > { %p1246_p6 = pnand %p1254_p1, %p2108_p2 }
 0x293   : > { %p1247_p11 = pneg %p1246_p6 }
 0x295   : > { %1429 = dma.done.wait (%p1247_p11), %s1061_s27, 4096  }
 0x296   : > { %1431 = vsyncadd (%p1247_p11), %s1061_s27, 4294963200  ;;  %p19_p5 = scmp.ge.s32.totalorder %s1563_s17, 6   ;;  %s2109_s18 = smov %s1438_s19 }
 0x297   : > { %s2110_s19 = smov %s1442_s20  ;;  %s2111_s20 = smov %s1572_s28 }
 0x298   : > { %s2112_s21 = smov %s1563_s17  ;;  %21 = sbr.rel (!%p19_p5) target bundleno = 6 (0x6), region = 93 }
 0x29d   :  { %1066 = vsyncpa [#allocation3], 1 }
 0x29e   :  { %1068 = vsyncpa [#allocation3 + $0x1], 1 }
 0x29f   :  { %1069 = vsyncpa [#allocation6], 1 }
 0x2a0   :  { %1070 = vsyncpa [#allocation4], 1 }
 0x2a1   :  { %1072 = vsyncpa [#allocation4 + $0x1], 1 }

</bundles_post_ra>
